<compile_context>
chip_gen: v5e
topology: v5e:2x2
jax: 0.10.0
libtpu: 0.0.40
codegen_flags: <defaults>
</compile_context>

<pallas_src>
import math

import jax
import jax.numpy as jnp
from jax.experimental import pallas as pl
from jax.experimental.pallas import tpu as pltpu

# ---- model sizes (small, consistent with DecoderLayer(size=d_model, ...)) ----
D_MODEL = 32
N_HEADS = 4
D_K = D_MODEL // N_HEADS
D_FF = 64
EPS = 1e-6          # LayerNorm eps (added to std, matching the reference module)
_NEG_INF = -1e9     # masked_fill value


# ---------------------------------------------------------------------------
# in-kernel helpers (traced inside the Pallas kernel)
# ---------------------------------------------------------------------------
def _layernorm_k(x, a, b):
    # torch: mean over last dim; std is UNBIASED (/(n-1)); eps added to std.
    mean = jnp.mean(x, axis=-1, keepdims=True)
    var = jnp.sum((x - mean) ** 2, axis=-1, keepdims=True) / (x.shape[-1] - 1)
    inv = pl.reciprocal(jnp.sqrt(var) + EPS, approx=False)   # per-row reciprocal
    return a * (x - mean) * inv + b


def _mha_k(xq, xkv, add_mask, w_ref, b_ref):
    # Multi-head attention for one batch element.
    #   xq: [Tq, D], xkv: [Tk, D], add_mask: [Tq, Tk] additive (0 or -1e9)
    #   w_ref: [4, D, D] = (Wq, Wk, Wv, Wo), b_ref: [4, 1, D]
    tq, tk = xq.shape[0], xkv.shape[0]
    wq, wk, wv, wo = w_ref[0], w_ref[1], w_ref[2], w_ref[3]
    bq, bk, bv, bo = b_ref[0], b_ref[1], b_ref[2], b_ref[3]

    q = jnp.dot(xq, wq, preferred_element_type=jnp.float32) + bq
    k = jnp.dot(xkv, wk, preferred_element_type=jnp.float32) + bk
    v = jnp.dot(xkv, wv, preferred_element_type=jnp.float32) + bv

    qh = q.reshape(tq, N_HEADS, D_K)
    kh = k.reshape(tk, N_HEADS, D_K)
    vh = v.reshape(tk, N_HEADS, D_K)

    # head-batched score / softmax / context
    s = jnp.einsum('qhd,khd->hqk', qh, kh, preferred_element_type=jnp.float32)
    s = s * (1.0 / math.sqrt(D_K)) + add_mask[None, :, :]
    m = jnp.max(s, axis=-1, keepdims=True)
    p = jnp.exp(s - m)
    p = p * pl.reciprocal(jnp.sum(p, axis=-1, keepdims=True), approx=False)
    ctx = jnp.einsum('hqk,khd->qhd', p, vh, preferred_element_type=jnp.float32)

    ctx = ctx.reshape(tq, D_MODEL)
    return jnp.dot(ctx, wo, preferred_element_type=jnp.float32) + bo


def _ffn_k(x, w1, b1, w2, b2):
    h = jnp.maximum(jnp.dot(x, w1, preferred_element_type=jnp.float32) + b1, 0.0)
    return jnp.dot(h, w2, preferred_element_type=jnp.float32) + b2


# ---------------------------------------------------------------------------
# single fused kernel: all three SublayerConnections, x stays in VMEM
# ---------------------------------------------------------------------------
def decoder_layer_kernel(x_ref, mem_ref, tgt_m_ref, src_m_ref,
                         sa_lna, sa_lnb, sa_w, sa_b,
                         ca_lna, ca_lnb, ca_w, ca_b,
                         ff_lna, ff_lnb, w1_ref, b1_ref, w2_ref, b2_ref,
                         o_ref):
    x = x_ref[0]          # [T_t, D]
    mem = mem_ref[0]      # [T_s, D]
    tgt_m = tgt_m_ref[0]  # [T_t, T_t] additive mask
    src_m = src_m_ref[0]  # [T_t, T_s] additive mask

    # sublayer 0: x + SelfAttn(LN(x), LN(x), LN(x), tgt_mask)
    xn = _layernorm_k(x, sa_lna[...], sa_lnb[...])
    x = x + _mha_k(xn, xn, tgt_m, sa_w, sa_b)

    # sublayer 1: x + SrcAttn(LN(x), memory, memory, src_mask)
    xn = _layernorm_k(x, ca_lna[...], ca_lnb[...])
    x = x + _mha_k(xn, mem, src_m, ca_w, ca_b)

    # sublayer 2: x + FFN(LN(x))
    xn = _layernorm_k(x, ff_lna[...], ff_lnb[...])
    x = x + _ffn_k(xn, w1_ref[...], b1_ref[...], w2_ref[...], b2_ref[...])

    o_ref[0] = x


# ---------------------------------------------------------------------------
# wrapper: one pallas_call, grid over batch, weights replicated
# ---------------------------------------------------------------------------
def _batched_spec(shape):
    nd = len(shape)
    block = (1,) + tuple(shape[1:])

    def imap(b):
        return (b,) + (0,) * (nd - 1)

    return pl.BlockSpec(block, imap)


def _replicated_spec(shape):
    nd = len(shape)

    def imap(b):
        return (0,) * nd

    return pl.BlockSpec(tuple(shape), imap)


@jax.jit
def decoder_layer(x, memory, src_mask, tgt_mask, params):
    batch = x.shape[0]

    # additive masks computed once in the wrapper (no compare+select in-kernel)
    tgt_add = (1.0 - tgt_mask) * _NEG_INF
    src_add = (1.0 - src_mask) * _NEG_INF

    def pack_attn(p):
        w = jnp.stack([p['wq'], p['wk'], p['wv'], p['wo']], axis=0)  # [4, D, D]
        b = jnp.stack([p['bq'], p['bk'], p['bv'], p['bo']], axis=0)  # [4, 1, D]
        return p['ln_a'], p['ln_b'], w, b

    sa = pack_attn(params['self'])
    ca = pack_attn(params['src'])
    pf = params['ffn']
    weight_args = (*sa, *ca,
                   pf['ln_a'], pf['ln_b'], pf['w1'], pf['b1'], pf['w2'], pf['b2'])

    args = (x, memory, tgt_add, src_add) + weight_args
    in_specs = ([_batched_spec(x.shape),
                 _batched_spec(memory.shape),
                 _batched_spec(tgt_add.shape),
                 _batched_spec(src_add.shape)]
                + [_replicated_spec(a.shape) for a in weight_args])

    return pl.pallas_call(
        decoder_layer_kernel,
        out_shape=jax.ShapeDtypeStruct(x.shape, x.dtype),
        grid=(batch,),
        in_specs=in_specs,
        out_specs=_batched_spec(x.shape),
        input_output_aliases={0: 0},   # output reuses x's buffer
        compiler_params=pltpu.CompilerParams(
            dimension_semantics=("parallel",)),   # both TCs on v7x
    )(*args)


# ---------------------------------------------------------------------------
# pure-JAX reference (torch semantics: masked_fill, unbiased std, divisions)
# ---------------------------------------------------------------------------
def _layernorm_ref(x, a, b):
    mean = jnp.mean(x, axis=-1, keepdims=True)
    var = jnp.sum((x - mean) ** 2, axis=-1, keepdims=True) / (x.shape[-1] - 1)
    std = jnp.sqrt(var)
    return a * (x - mean) / (std + EPS) + b


def _mha_ref(xq, xkv, mask, wq, bq, wk, bk, wv, bv, wo, bo):
    q = jnp.einsum('btd,de->bte', xq, wq, preferred_element_type=jnp.float32) + bq
    k = jnp.einsum('btd,de->bte', xkv, wk, preferred_element_type=jnp.float32) + bk
    v = jnp.einsum('btd,de->bte', xkv, wv, preferred_element_type=jnp.float32) + bv
    scale = 1.0 / math.sqrt(D_K)
    heads = []
    for h in range(N_HEADS):
        sl = slice(h * D_K, (h + 1) * D_K)
        qh, kh, vh = q[..., sl], k[..., sl], v[..., sl]
        s = jnp.einsum('bqd,bkd->bqk', qh, kh,
                       preferred_element_type=jnp.float32) * scale
        s = jnp.where(mask == 0.0, _NEG_INF, s)
        m = jnp.max(s, axis=-1, keepdims=True)
        p = jnp.exp(s - m)
        p = p / jnp.sum(p, axis=-1, keepdims=True)
        heads.append(jnp.einsum('bqk,bkd->bqd', p, vh,
                                preferred_element_type=jnp.float32))
    cat = jnp.concatenate(heads, axis=-1)
    return jnp.einsum('btd,de->bte', cat, wo, preferred_element_type=jnp.float32) + bo


def _ffn_ref(x, w1, b1, w2, b2):
    h = jnp.maximum(
        jnp.einsum('btd,df->btf', x, w1, preferred_element_type=jnp.float32) + b1, 0.0)
    return jnp.einsum('btf,fd->btd', h, w2, preferred_element_type=jnp.float32) + b2


def decoder_layer_ref(x, memory, src_mask, tgt_mask, params):
    p = params['self']
    xn = _layernorm_ref(x, p['ln_a'], p['ln_b'])
    x = x + _mha_ref(xn, xn, tgt_mask, p['wq'], p['bq'], p['wk'], p['bk'],
                     p['wv'], p['bv'], p['wo'], p['bo'])
    p = params['src']
    xn = _layernorm_ref(x, p['ln_a'], p['ln_b'])
    x = x + _mha_ref(xn, memory, src_mask, p['wq'], p['bq'], p['wk'], p['bk'],
                     p['wv'], p['bv'], p['wo'], p['bo'])
    p = params['ffn']
    xn = _layernorm_ref(x, p['ln_a'], p['ln_b'])
    return x + _ffn_ref(xn, p['w1'], p['b1'], p['w2'], p['b2'])


# ---------------------------------------------------------------------------
# deterministic parameter init (shapes match the PyTorch module)
# ---------------------------------------------------------------------------
def init_params(key):
    def linear(k, din, dout):
        kw, kb = jax.random.split(k)
        w = jax.random.normal(kw, (din, dout), jnp.float32) * 0.08
        b = jax.random.normal(kb, (1, dout), jnp.float32) * 0.02
        return w, b

    def attn_params(k):
        ks = jax.random.split(k, 4)
        wq, bq = linear(ks[0], D_MODEL, D_MODEL)
        wk, bk = linear(ks[1], D_MODEL, D_MODEL)
        wv, bv = linear(ks[2], D_MODEL, D_MODEL)
        wo, bo = linear(ks[3], D_MODEL, D_MODEL)
        return dict(ln_a=jnp.ones((1, D_MODEL), jnp.float32),
                    ln_b=jnp.zeros((1, D_MODEL), jnp.float32),
                    wq=wq, bq=bq, wk=wk, bk=bk, wv=wv, bv=bv, wo=wo, bo=bo)

    k_self, k_src, k_ffn = jax.random.split(key, 3)
    k1, k2 = jax.random.split(k_ffn)
    w1, b1 = linear(k1, D_MODEL, D_FF)
    w2, b2 = linear(k2, D_FF, D_MODEL)
    return dict(
        self=attn_params(k_self),
        src=attn_params(k_src),
        ffn=dict(ln_a=jnp.ones((1, D_MODEL), jnp.float32),
                 ln_b=jnp.zeros((1, D_MODEL), jnp.float32),
                 w1=w1, b1=b1, w2=w2, b2=b2),
    )


if __name__ == "__main__":
    B, T_TGT, T_SRC = 2, 8, 10

    key = jax.random.PRNGKey(0)
    kx, km, kp = jax.random.split(key, 3)
    x = jax.random.normal(kx, (B, T_TGT, D_MODEL), jnp.float32)
    memory = jax.random.normal(km, (B, T_SRC, D_MODEL), jnp.float32)

    # tgt_mask: causal (subsequent) mask; src_mask: all-ones padding mask
    tgt_mask = jnp.broadcast_to(
        jnp.tril(jnp.ones((T_TGT, T_TGT), jnp.float32)), (B, T_TGT, T_TGT))
    src_mask = jnp.ones((B, T_TGT, T_SRC), jnp.float32)

    params = init_params(kp)

    # compute the reference first (the fused kernel aliases x's output buffer)
    ref = jax.block_until_ready(
        decoder_layer_ref(x, memory, src_mask, tgt_mask, params))

    out = jax.block_until_ready(
        decoder_layer(x, memory, src_mask, tgt_mask, params))

    assert out.shape == (B, T_TGT, D_MODEL) and out.dtype == jnp.float32
    assert jnp.allclose(out, ref, rtol=1e-4, atol=1e-4), \
        "Pallas output mismatch vs reference"

    # TODO(synk): dropout is modeled as identity (inference mode); training-mode RNG dropout not implemented.
    print("KERNEL_OK")
</pallas_src>

<mosaic_0001>
module attributes {stable_mosaic.version = 11 : i64} {
  func.func @decoder_layer_kernel(%arg0: i32, %arg1: memref<1x8x32xf32, #tpu.memory_space<vmem>>, %arg2: memref<1x10x32xf32, #tpu.memory_space<vmem>>, %arg3: memref<1x8x8xf32, #tpu.memory_space<vmem>>, %arg4: memref<1x8x10xf32, #tpu.memory_space<vmem>>, %arg5: memref<1x32xf32, #tpu.memory_space<vmem>>, %arg6: memref<1x32xf32, #tpu.memory_space<vmem>>, %arg7: memref<4x32x32xf32, #tpu.memory_space<vmem>>, %arg8: memref<4x1x32xf32, #tpu.memory_space<vmem>>, %arg9: memref<1x32xf32, #tpu.memory_space<vmem>>, %arg10: memref<1x32xf32, #tpu.memory_space<vmem>>, %arg11: memref<4x32x32xf32, #tpu.memory_space<vmem>>, %arg12: memref<4x1x32xf32, #tpu.memory_space<vmem>>, %arg13: memref<1x32xf32, #tpu.memory_space<vmem>>, %arg14: memref<1x32xf32, #tpu.memory_space<vmem>>, %arg15: memref<32x64xf32, #tpu.memory_space<vmem>>, %arg16: memref<1x64xf32, #tpu.memory_space<vmem>>, %arg17: memref<64x32xf32, #tpu.memory_space<vmem>>, %arg18: memref<1x32xf32, #tpu.memory_space<vmem>>, %arg19: memref<1x8x32xf32, #tpu.memory_space<vmem>>) attributes {dimension_semantics = [#tpu.dimension_semantics<parallel>], iteration_bounds = array<i64: 2>, scalar_prefetch = 0 : i64, scratch_operands = 0 : i64, tpu.core_type = #tpu.core_type<tc>, window_params = [{transform_indices = @transform_0, window_bounds = array<i64: 1, 8, 32>}, {transform_indices = @transform_1, window_bounds = array<i64: 1, 10, 32>}, {transform_indices = @transform_2, window_bounds = array<i64: 1, 8, 8>}, {transform_indices = @transform_3, window_bounds = array<i64: 1, 8, 10>}, {pipeline_mode = #tpu.pipeline_mode<synchronous>, transform_indices = @transform_4, window_bounds = array<i64: 1, 32>}, {pipeline_mode = #tpu.pipeline_mode<synchronous>, transform_indices = @transform_5, window_bounds = array<i64: 1, 32>}, {pipeline_mode = #tpu.pipeline_mode<synchronous>, transform_indices = @transform_6, window_bounds = array<i64: 4, 32, 32>}, {pipeline_mode = #tpu.pipeline_mode<synchronous>, transform_indices = @transform_7, window_bounds = array<i64: 4, 1, 32>}, {pipeline_mode = #tpu.pipeline_mode<synchronous>, transform_indices = @transform_8, window_bounds = array<i64: 1, 32>}, {pipeline_mode = #tpu.pipeline_mode<synchronous>, transform_indices = @transform_9, window_bounds = array<i64: 1, 32>}, {pipeline_mode = #tpu.pipeline_mode<synchronous>, transform_indices = @transform_10, window_bounds = array<i64: 4, 32, 32>}, {pipeline_mode = #tpu.pipeline_mode<synchronous>, transform_indices = @transform_11, window_bounds = array<i64: 4, 1, 32>}, {pipeline_mode = #tpu.pipeline_mode<synchronous>, transform_indices = @transform_12, window_bounds = array<i64: 1, 32>}, {pipeline_mode = #tpu.pipeline_mode<synchronous>, transform_indices = @transform_13, window_bounds = array<i64: 1, 32>}, {pipeline_mode = #tpu.pipeline_mode<synchronous>, transform_indices = @transform_14, window_bounds = array<i64: 32, 64>}, {pipeline_mode = #tpu.pipeline_mode<synchronous>, transform_indices = @transform_15, window_bounds = array<i64: 1, 64>}, {pipeline_mode = #tpu.pipeline_mode<synchronous>, transform_indices = @transform_16, window_bounds = array<i64: 64, 32>}, {pipeline_mode = #tpu.pipeline_mode<synchronous>, transform_indices = @transform_17, window_bounds = array<i64: 1, 32>}, {transform_indices = @transform_18, window_bounds = array<i64: 1, 8, 32>}]} {
    %c0 = arith.constant 0 : index
    %c0_0 = arith.constant 0 : index
    %c0_1 = arith.constant 0 : index
    %0 = vector.load %arg1[%c0, %c0_0, %c0_1] : memref<1x8x32xf32, #tpu.memory_space<vmem>>, vector<1x8x32xf32>
    %1 = vector.shape_cast %0 : vector<1x8x32xf32> to vector<8x32xf32>
    %c0_2 = arith.constant 0 : index
    %c0_3 = arith.constant 0 : index
    %c0_4 = arith.constant 0 : index
    %2 = vector.load %arg2[%c0_2, %c0_3, %c0_4] : memref<1x10x32xf32, #tpu.memory_space<vmem>>, vector<1x10x32xf32>
    %3 = vector.shape_cast %2 : vector<1x10x32xf32> to vector<10x32xf32>
    %c0_5 = arith.constant 0 : index
    %c0_6 = arith.constant 0 : index
    %c0_7 = arith.constant 0 : index
    %4 = vector.load %arg3[%c0_5, %c0_6, %c0_7] : memref<1x8x8xf32, #tpu.memory_space<vmem>>, vector<1x8x8xf32>
    %5 = vector.shape_cast %4 : vector<1x8x8xf32> to vector<8x8xf32>
    %c0_8 = arith.constant 0 : index
    %c0_9 = arith.constant 0 : index
    %c0_10 = arith.constant 0 : index
    %6 = vector.load %arg4[%c0_8, %c0_9, %c0_10] : memref<1x8x10xf32, #tpu.memory_space<vmem>>, vector<1x8x10xf32>
    %7 = vector.shape_cast %6 : vector<1x8x10xf32> to vector<8x10xf32>
    %c0_11 = arith.constant 0 : index
    %c0_12 = arith.constant 0 : index
    %8 = vector.load %arg5[%c0_11, %c0_12] : memref<1x32xf32, #tpu.memory_space<vmem>>, vector<1x32xf32>
    %c0_13 = arith.constant 0 : index
    %c0_14 = arith.constant 0 : index
    %9 = vector.load %arg6[%c0_13, %c0_14] : memref<1x32xf32, #tpu.memory_space<vmem>>, vector<1x32xf32>
    %cst = arith.constant dense<0.000000e+00> : vector<8xf32>
    %10 = vector.multi_reduction <add>, %1, %cst [1] : vector<8x32xf32> to vector<8xf32>
    %11 = vector.shape_cast %10 : vector<8xf32> to vector<8x1xf32>
    %cst_15 = arith.constant 3.200000e+01 : f32
    %12 = vector.broadcast %cst_15 : f32 to vector<8x1xf32>
    %13 = arith.divf %11, %12 : vector<8x1xf32>
    %14 = vector.broadcast %13 : vector<8x1xf32> to vector<8x32xf32>
    %15 = arith.subf %1, %14 : vector<8x32xf32>
    %16 = arith.mulf %15, %15 : vector<8x32xf32>
    %cst_16 = arith.constant dense<0.000000e+00> : vector<8xf32>
    %17 = vector.multi_reduction <add>, %16, %cst_16 [1] : vector<8x32xf32> to vector<8xf32>
    %18 = vector.shape_cast %17 : vector<8xf32> to vector<8x1xf32>
    %cst_17 = arith.constant 3.100000e+01 : f32
    %19 = vector.broadcast %cst_17 : f32 to vector<8x1xf32>
    %20 = arith.divf %18, %19 : vector<8x1xf32>
    %21 = math.sqrt %20 : vector<8x1xf32>
    %cst_18 = arith.constant 9.99999997E-7 : f32
    %22 = vector.broadcast %cst_18 : f32 to vector<8x1xf32>
    %23 = arith.addf %21, %22 : vector<8x1xf32>
    %24 = tpu.reciprocal %23 : vector<8x1xf32> -> vector<8x1xf32>
    %25 = vector.broadcast %13 : vector<8x1xf32> to vector<8x32xf32>
    %26 = arith.subf %1, %25 : vector<8x32xf32>
    %27 = vector.broadcast %8 : vector<1x32xf32> to vector<8x32xf32>
    %28 = arith.mulf %27, %26 : vector<8x32xf32>
    %29 = vector.broadcast %24 : vector<8x1xf32> to vector<8x32xf32>
    %30 = arith.mulf %28, %29 : vector<8x32xf32>
    %31 = vector.broadcast %9 : vector<1x32xf32> to vector<8x32xf32>
    %32 = arith.addf %30, %31 : vector<8x32xf32>
    %c0_19 = arith.constant 0 : index
    %c0_20 = arith.constant 0 : index
    %c0_21 = arith.constant 0 : index
    %33 = vector.load %arg7[%c0_19, %c0_20, %c0_21] : memref<4x32x32xf32, #tpu.memory_space<vmem>>, vector<1x32x32xf32>
    %34 = vector.shape_cast %33 : vector<1x32x32xf32> to vector<32x32xf32>
    %c1 = arith.constant 1 : index
    %c0_22 = arith.constant 0 : index
    %c0_23 = arith.constant 0 : index
    %35 = vector.load %arg7[%c1, %c0_22, %c0_23] : memref<4x32x32xf32, #tpu.memory_space<vmem>>, vector<1x32x32xf32>
    %36 = vector.shape_cast %35 : vector<1x32x32xf32> to vector<32x32xf32>
    %c2 = arith.constant 2 : index
    %c0_24 = arith.constant 0 : index
    %c0_25 = arith.constant 0 : index
    %37 = vector.load %arg7[%c2, %c0_24, %c0_25] : memref<4x32x32xf32, #tpu.memory_space<vmem>>, vector<1x32x32xf32>
    %38 = vector.shape_cast %37 : vector<1x32x32xf32> to vector<32x32xf32>
    %c3 = arith.constant 3 : index
    %c0_26 = arith.constant 0 : index
    %c0_27 = arith.constant 0 : index
    %39 = vector.load %arg7[%c3, %c0_26, %c0_27] : memref<4x32x32xf32, #tpu.memory_space<vmem>>, vector<1x32x32xf32>
    %40 = vector.shape_cast %39 : vector<1x32x32xf32> to vector<32x32xf32>
    %c0_28 = arith.constant 0 : index
    %c0_29 = arith.constant 0 : index
    %c0_30 = arith.constant 0 : index
    %41 = vector.load %arg8[%c0_28, %c0_29, %c0_30] : memref<4x1x32xf32, #tpu.memory_space<vmem>>, vector<1x1x32xf32>
    %42 = vector.shape_cast %41 : vector<1x1x32xf32> to vector<1x32xf32>
    %c1_31 = arith.constant 1 : index
    %c0_32 = arith.constant 0 : index
    %c0_33 = arith.constant 0 : index
    %43 = vector.load %arg8[%c1_31, %c0_32, %c0_33] : memref<4x1x32xf32, #tpu.memory_space<vmem>>, vector<1x1x32xf32>
    %44 = vector.shape_cast %43 : vector<1x1x32xf32> to vector<1x32xf32>
    %c2_34 = arith.constant 2 : index
    %c0_35 = arith.constant 0 : index
    %c0_36 = arith.constant 0 : index
    %45 = vector.load %arg8[%c2_34, %c0_35, %c0_36] : memref<4x1x32xf32, #tpu.memory_space<vmem>>, vector<1x1x32xf32>
    %46 = vector.shape_cast %45 : vector<1x1x32xf32> to vector<1x32xf32>
    %c3_37 = arith.constant 3 : index
    %c0_38 = arith.constant 0 : index
    %c0_39 = arith.constant 0 : index
    %47 = vector.load %arg8[%c3_37, %c0_38, %c0_39] : memref<4x1x32xf32, #tpu.memory_space<vmem>>, vector<1x1x32xf32>
    %48 = vector.shape_cast %47 : vector<1x1x32xf32> to vector<1x32xf32>
    %cst_40 = arith.constant dense<0.000000e+00> : vector<8x32xf32>
    %49 = tpu.matmul %32, %34, %cst_40 {dimension_numbers = #tpu.dot_dimension_numbers<[1], [0], [0], [1], [0, 0, 1, 1], [], []>} : vector<8x32xf32>, vector<32x32xf32>, vector<8x32xf32> -> vector<8x32xf32>
    %50 = vector.broadcast %42 : vector<1x32xf32> to vector<8x32xf32>
    %51 = arith.addf %49, %50 : vector<8x32xf32>
    %cst_41 = arith.constant dense<0.000000e+00> : vector<8x32xf32>
    %52 = tpu.matmul %32, %36, %cst_41 {dimension_numbers = #tpu.dot_dimension_numbers<[1], [0], [0], [1], [0, 0, 1, 1], [], []>} : vector<8x32xf32>, vector<32x32xf32>, vector<8x32xf32> -> vector<8x32xf32>
    %53 = vector.broadcast %44 : vector<1x32xf32> to vector<8x32xf32>
    %54 = arith.addf %52, %53 : vector<8x32xf32>
    %cst_42 = arith.constant dense<0.000000e+00> : vector<8x32xf32>
    %55 = tpu.matmul %32, %38, %cst_42 {dimension_numbers = #tpu.dot_dimension_numbers<[1], [0], [0], [1], [0, 0, 1, 1], [], []>} : vector<8x32xf32>, vector<32x32xf32>, vector<8x32xf32> -> vector<8x32xf32>
    %56 = vector.broadcast %46 : vector<1x32xf32> to vector<8x32xf32>
    %57 = arith.addf %55, %56 : vector<8x32xf32>
    %58 = vector.shape_cast %51 : vector<8x32xf32> to vector<8x4x8xf32>
    %59 = vector.shape_cast %54 : vector<8x32xf32> to vector<8x4x8xf32>
    %60 = vector.shape_cast %57 : vector<8x32xf32> to vector<8x4x8xf32>
    "tpu.trace_start"() <{level = 10 : i32, message = "qhd,khd->hqk"}> : () -> ()
    %cst_43 = arith.constant dense<0.000000e+00> : vector<4x8x8xf32>
    %61 = tpu.matmul %58, %59, %cst_43 {dimension_numbers = #tpu.dot_dimension_numbers<[2], [2], [0], [0], [0, 1, 0, 0, 1, 0], [1], [1]>} : vector<8x4x8xf32>, vector<8x4x8xf32>, vector<4x8x8xf32> -> vector<4x8x8xf32>
    "tpu.trace_stop"() : () -> ()
    %cst_44 = arith.constant 0.353553385 : f32
    %62 = vector.broadcast %cst_44 : f32 to vector<4x8x8xf32>
    %63 = arith.mulf %61, %62 : vector<4x8x8xf32>
    %64 = vector.shape_cast %5 : vector<8x8xf32> to vector<1x8x8xf32>
    %65 = vector.broadcast %64 : vector<1x8x8xf32> to vector<4x8x8xf32>
    %66 = arith.addf %63, %65 : vector<4x8x8xf32>
    %cst_45 = arith.constant dense<0xFF800000> : vector<4x8xf32>
    %67 = vector.multi_reduction <maximumf>, %66, %cst_45 [2] : vector<4x8x8xf32> to vector<4x8xf32>
    %68 = vector.shape_cast %67 : vector<4x8xf32> to vector<4x8x1xf32>
    %69 = vector.broadcast %68 : vector<4x8x1xf32> to vector<4x8x8xf32>
    %70 = arith.subf %66, %69 : vector<4x8x8xf32>
    %71 = math.exp %70 : vector<4x8x8xf32>
    %cst_46 = arith.constant dense<0.000000e+00> : vector<4x8xf32>
    %72 = vector.multi_reduction <add>, %71, %cst_46 [2] : vector<4x8x8xf32> to vector<4x8xf32>
    %73 = vector.shape_cast %72 : vector<4x8xf32> to vector<4x8x1xf32>
    %74 = tpu.reciprocal %73 : vector<4x8x1xf32> -> vector<4x8x1xf32>
    %75 = vector.broadcast %74 : vector<4x8x1xf32> to vector<4x8x8xf32>
    %76 = arith.mulf %71, %75 : vector<4x8x8xf32>
    "tpu.trace_start"() <{level = 10 : i32, message = "hqk,khd->qhd"}> : () -> ()
    %cst_47 = arith.constant dense<0.000000e+00> : vector<4x8x8xf32>
    %77 = tpu.matmul %60, %76, %cst_47 {dimension_numbers = #tpu.dot_dimension_numbers<[0], [2], [2], [1], [0, 1, 0, 2, 1, 1], [1], [0]>} : vector<8x4x8xf32>, vector<4x8x8xf32>, vector<4x8x8xf32> -> vector<4x8x8xf32>
    %78 = tpu.transpose %77, [2, 0, 1] : vector<4x8x8xf32> -> vector<8x4x8xf32>
    "tpu.trace_stop"() : () -> ()
    %79 = vector.shape_cast %78 : vector<8x4x8xf32> to vector<8x32xf32>
    %cst_48 = arith.constant dense<0.000000e+00> : vector<8x32xf32>
    %80 = tpu.matmul %79, %40, %cst_48 {dimension_numbers = #tpu.dot_dimension_numbers<[1], [0], [0], [1], [0, 0, 1, 1], [], []>} : vector<8x32xf32>, vector<32x32xf32>, vector<8x32xf32> -> vector<8x32xf32>
    %81 = vector.broadcast %48 : vector<1x32xf32> to vector<8x32xf32>
    %82 = arith.addf %80, %81 : vector<8x32xf32>
    %83 = arith.addf %1, %82 : vector<8x32xf32>
    %c0_49 = arith.constant 0 : index
    %c0_50 = arith.constant 0 : index
    %84 = vector.load %arg9[%c0_49, %c0_50] : memref<1x32xf32, #tpu.memory_space<vmem>>, vector<1x32xf32>
    %c0_51 = arith.constant 0 : index
    %c0_52 = arith.constant 0 : index
    %85 = vector.load %arg10[%c0_51, %c0_52] : memref<1x32xf32, #tpu.memory_space<vmem>>, vector<1x32xf32>
    %cst_53 = arith.constant dense<0.000000e+00> : vector<8xf32>
    %86 = vector.multi_reduction <add>, %83, %cst_53 [1] : vector<8x32xf32> to vector<8xf32>
    %87 = vector.shape_cast %86 : vector<8xf32> to vector<8x1xf32>
    %cst_54 = arith.constant 3.200000e+01 : f32
    %88 = vector.broadcast %cst_54 : f32 to vector<8x1xf32>
    %89 = arith.divf %87, %88 : vector<8x1xf32>
    %90 = vector.broadcast %89 : vector<8x1xf32> to vector<8x32xf32>
    %91 = arith.subf %83, %90 : vector<8x32xf32>
    %92 = arith.mulf %91, %91 : vector<8x32xf32>
    %cst_55 = arith.constant dense<0.000000e+00> : vector<8xf32>
    %93 = vector.multi_reduction <add>, %92, %cst_55 [1] : vector<8x32xf32> to vector<8xf32>
    %94 = vector.shape_cast %93 : vector<8xf32> to vector<8x1xf32>
    %cst_56 = arith.constant 3.100000e+01 : f32
    %95 = vector.broadcast %cst_56 : f32 to vector<8x1xf32>
    %96 = arith.divf %94, %95 : vector<8x1xf32>
    %97 = math.sqrt %96 : vector<8x1xf32>
    %cst_57 = arith.constant 9.99999997E-7 : f32
    %98 = vector.broadcast %cst_57 : f32 to vector<8x1xf32>
    %99 = arith.addf %97, %98 : vector<8x1xf32>
    %100 = tpu.reciprocal %99 : vector<8x1xf32> -> vector<8x1xf32>
    %101 = vector.broadcast %89 : vector<8x1xf32> to vector<8x32xf32>
    %102 = arith.subf %83, %101 : vector<8x32xf32>
    %103 = vector.broadcast %84 : vector<1x32xf32> to vector<8x32xf32>
    %104 = arith.mulf %103, %102 : vector<8x32xf32>
    %105 = vector.broadcast %100 : vector<8x1xf32> to vector<8x32xf32>
    %106 = arith.mulf %104, %105 : vector<8x32xf32>
    %107 = vector.broadcast %85 : vector<1x32xf32> to vector<8x32xf32>
    %108 = arith.addf %106, %107 : vector<8x32xf32>
    %c0_58 = arith.constant 0 : index
    %c0_59 = arith.constant 0 : index
    %c0_60 = arith.constant 0 : index
    %109 = vector.load %arg11[%c0_58, %c0_59, %c0_60] : memref<4x32x32xf32, #tpu.memory_space<vmem>>, vector<1x32x32xf32>
    %110 = vector.shape_cast %109 : vector<1x32x32xf32> to vector<32x32xf32>
    %c1_61 = arith.constant 1 : index
    %c0_62 = arith.constant 0 : index
    %c0_63 = arith.constant 0 : index
    %111 = vector.load %arg11[%c1_61, %c0_62, %c0_63] : memref<4x32x32xf32, #tpu.memory_space<vmem>>, vector<1x32x32xf32>
    %112 = vector.shape_cast %111 : vector<1x32x32xf32> to vector<32x32xf32>
    %c2_64 = arith.constant 2 : index
    %c0_65 = arith.constant 0 : index
    %c0_66 = arith.constant 0 : index
    %113 = vector.load %arg11[%c2_64, %c0_65, %c0_66] : memref<4x32x32xf32, #tpu.memory_space<vmem>>, vector<1x32x32xf32>
    %114 = vector.shape_cast %113 : vector<1x32x32xf32> to vector<32x32xf32>
    %c3_67 = arith.constant 3 : index
    %c0_68 = arith.constant 0 : index
    %c0_69 = arith.constant 0 : index
    %115 = vector.load %arg11[%c3_67, %c0_68, %c0_69] : memref<4x32x32xf32, #tpu.memory_space<vmem>>, vector<1x32x32xf32>
    %116 = vector.shape_cast %115 : vector<1x32x32xf32> to vector<32x32xf32>
    %c0_70 = arith.constant 0 : index
    %c0_71 = arith.constant 0 : index
    %c0_72 = arith.constant 0 : index
    %117 = vector.load %arg12[%c0_70, %c0_71, %c0_72] : memref<4x1x32xf32, #tpu.memory_space<vmem>>, vector<1x1x32xf32>
    %118 = vector.shape_cast %117 : vector<1x1x32xf32> to vector<1x32xf32>
    %c1_73 = arith.constant 1 : index
    %c0_74 = arith.constant 0 : index
    %c0_75 = arith.constant 0 : index
    %119 = vector.load %arg12[%c1_73, %c0_74, %c0_75] : memref<4x1x32xf32, #tpu.memory_space<vmem>>, vector<1x1x32xf32>
    %120 = vector.shape_cast %119 : vector<1x1x32xf32> to vector<1x32xf32>
    %c2_76 = arith.constant 2 : index
    %c0_77 = arith.constant 0 : index
    %c0_78 = arith.constant 0 : index
    %121 = vector.load %arg12[%c2_76, %c0_77, %c0_78] : memref<4x1x32xf32, #tpu.memory_space<vmem>>, vector<1x1x32xf32>
    %122 = vector.shape_cast %121 : vector<1x1x32xf32> to vector<1x32xf32>
    %c3_79 = arith.constant 3 : index
    %c0_80 = arith.constant 0 : index
    %c0_81 = arith.constant 0 : index
    %123 = vector.load %arg12[%c3_79, %c0_80, %c0_81] : memref<4x1x32xf32, #tpu.memory_space<vmem>>, vector<1x1x32xf32>
    %124 = vector.shape_cast %123 : vector<1x1x32xf32> to vector<1x32xf32>
    %cst_82 = arith.constant dense<0.000000e+00> : vector<8x32xf32>
    %125 = tpu.matmul %108, %110, %cst_82 {dimension_numbers = #tpu.dot_dimension_numbers<[1], [0], [0], [1], [0, 0, 1, 1], [], []>} : vector<8x32xf32>, vector<32x32xf32>, vector<8x32xf32> -> vector<8x32xf32>
    %126 = vector.broadcast %118 : vector<1x32xf32> to vector<8x32xf32>
    %127 = arith.addf %125, %126 : vector<8x32xf32>
    %cst_83 = arith.constant dense<0.000000e+00> : vector<10x32xf32>
    %128 = tpu.matmul %3, %112, %cst_83 {dimension_numbers = #tpu.dot_dimension_numbers<[1], [0], [0], [1], [0, 0, 1, 1], [], []>} : vector<10x32xf32>, vector<32x32xf32>, vector<10x32xf32> -> vector<10x32xf32>
    %129 = vector.broadcast %120 : vector<1x32xf32> to vector<10x32xf32>
    %130 = arith.addf %128, %129 : vector<10x32xf32>
    %cst_84 = arith.constant dense<0.000000e+00> : vector<10x32xf32>
    %131 = tpu.matmul %3, %114, %cst_84 {dimension_numbers = #tpu.dot_dimension_numbers<[1], [0], [0], [1], [0, 0, 1, 1], [], []>} : vector<10x32xf32>, vector<32x32xf32>, vector<10x32xf32> -> vector<10x32xf32>
    %132 = vector.broadcast %122 : vector<1x32xf32> to vector<10x32xf32>
    %133 = arith.addf %131, %132 : vector<10x32xf32>
    %134 = vector.shape_cast %127 : vector<8x32xf32> to vector<8x4x8xf32>
    %135 = vector.shape_cast %130 : vector<10x32xf32> to vector<10x4x8xf32>
    %136 = vector.shape_cast %133 : vector<10x32xf32> to vector<10x4x8xf32>
    "tpu.trace_start"() <{level = 10 : i32, message = "qhd,khd->hqk"}> : () -> ()
    %cst_85 = arith.constant dense<0.000000e+00> : vector<4x8x10xf32>
    %137 = tpu.matmul %134, %135, %cst_85 {dimension_numbers = #tpu.dot_dimension_numbers<[2], [2], [0], [0], [0, 1, 0, 0, 1, 0], [1], [1]>} : vector<8x4x8xf32>, vector<10x4x8xf32>, vector<4x8x10xf32> -> vector<4x8x10xf32>
    "tpu.trace_stop"() : () -> ()
    %cst_86 = arith.constant 0.353553385 : f32
    %138 = vector.broadcast %cst_86 : f32 to vector<4x8x10xf32>
    %139 = arith.mulf %137, %138 : vector<4x8x10xf32>
    %140 = vector.shape_cast %7 : vector<8x10xf32> to vector<1x8x10xf32>
    %141 = vector.broadcast %140 : vector<1x8x10xf32> to vector<4x8x10xf32>
    %142 = arith.addf %139, %141 : vector<4x8x10xf32>
    %cst_87 = arith.constant dense<0xFF800000> : vector<4x8xf32>
    %143 = vector.multi_reduction <maximumf>, %142, %cst_87 [2] : vector<4x8x10xf32> to vector<4x8xf32>
    %144 = vector.shape_cast %143 : vector<4x8xf32> to vector<4x8x1xf32>
    %145 = vector.broadcast %144 : vector<4x8x1xf32> to vector<4x8x10xf32>
    %146 = arith.subf %142, %145 : vector<4x8x10xf32>
    %147 = math.exp %146 : vector<4x8x10xf32>
    %cst_88 = arith.constant dense<0.000000e+00> : vector<4x8xf32>
    %148 = vector.multi_reduction <add>, %147, %cst_88 [2] : vector<4x8x10xf32> to vector<4x8xf32>
    %149 = vector.shape_cast %148 : vector<4x8xf32> to vector<4x8x1xf32>
    %150 = tpu.reciprocal %149 : vector<4x8x1xf32> -> vector<4x8x1xf32>
    %151 = vector.broadcast %150 : vector<4x8x1xf32> to vector<4x8x10xf32>
    %152 = arith.mulf %147, %151 : vector<4x8x10xf32>
    "tpu.trace_start"() <{level = 10 : i32, message = "hqk,khd->qhd"}> : () -> ()
    %cst_89 = arith.constant dense<0.000000e+00> : vector<4x8x8xf32>
    %153 = tpu.matmul %136, %152, %cst_89 {dimension_numbers = #tpu.dot_dimension_numbers<[0], [2], [2], [1], [0, 1, 0, 2, 1, 1], [1], [0]>} : vector<10x4x8xf32>, vector<4x8x10xf32>, vector<4x8x8xf32> -> vector<4x8x8xf32>
    %154 = tpu.transpose %153, [2, 0, 1] : vector<4x8x8xf32> -> vector<8x4x8xf32>
    "tpu.trace_stop"() : () -> ()
    %155 = vector.shape_cast %154 : vector<8x4x8xf32> to vector<8x32xf32>
    %cst_90 = arith.constant dense<0.000000e+00> : vector<8x32xf32>
    %156 = tpu.matmul %155, %116, %cst_90 {dimension_numbers = #tpu.dot_dimension_numbers<[1], [0], [0], [1], [0, 0, 1, 1], [], []>} : vector<8x32xf32>, vector<32x32xf32>, vector<8x32xf32> -> vector<8x32xf32>
    %157 = vector.broadcast %124 : vector<1x32xf32> to vector<8x32xf32>
    %158 = arith.addf %156, %157 : vector<8x32xf32>
    %159 = arith.addf %83, %158 : vector<8x32xf32>
    %c0_91 = arith.constant 0 : index
    %c0_92 = arith.constant 0 : index
    %160 = vector.load %arg13[%c0_91, %c0_92] : memref<1x32xf32, #tpu.memory_space<vmem>>, vector<1x32xf32>
    %c0_93 = arith.constant 0 : index
    %c0_94 = arith.constant 0 : index
    %161 = vector.load %arg14[%c0_93, %c0_94] : memref<1x32xf32, #tpu.memory_space<vmem>>, vector<1x32xf32>
    %cst_95 = arith.constant dense<0.000000e+00> : vector<8xf32>
    %162 = vector.multi_reduction <add>, %159, %cst_95 [1] : vector<8x32xf32> to vector<8xf32>
    %163 = vector.shape_cast %162 : vector<8xf32> to vector<8x1xf32>
    %cst_96 = arith.constant 3.200000e+01 : f32
    %164 = vector.broadcast %cst_96 : f32 to vector<8x1xf32>
    %165 = arith.divf %163, %164 : vector<8x1xf32>
    %166 = vector.broadcast %165 : vector<8x1xf32> to vector<8x32xf32>
    %167 = arith.subf %159, %166 : vector<8x32xf32>
    %168 = arith.mulf %167, %167 : vector<8x32xf32>
    %cst_97 = arith.constant dense<0.000000e+00> : vector<8xf32>
    %169 = vector.multi_reduction <add>, %168, %cst_97 [1] : vector<8x32xf32> to vector<8xf32>
    %170 = vector.shape_cast %169 : vector<8xf32> to vector<8x1xf32>
    %cst_98 = arith.constant 3.100000e+01 : f32
    %171 = vector.broadcast %cst_98 : f32 to vector<8x1xf32>
    %172 = arith.divf %170, %171 : vector<8x1xf32>
    %173 = math.sqrt %172 : vector<8x1xf32>
    %cst_99 = arith.constant 9.99999997E-7 : f32
    %174 = vector.broadcast %cst_99 : f32 to vector<8x1xf32>
    %175 = arith.addf %173, %174 : vector<8x1xf32>
    %176 = tpu.reciprocal %175 : vector<8x1xf32> -> vector<8x1xf32>
    %177 = vector.broadcast %165 : vector<8x1xf32> to vector<8x32xf32>
    %178 = arith.subf %159, %177 : vector<8x32xf32>
    %179 = vector.broadcast %160 : vector<1x32xf32> to vector<8x32xf32>
    %180 = arith.mulf %179, %178 : vector<8x32xf32>
    %181 = vector.broadcast %176 : vector<8x1xf32> to vector<8x32xf32>
    %182 = arith.mulf %180, %181 : vector<8x32xf32>
    %183 = vector.broadcast %161 : vector<1x32xf32> to vector<8x32xf32>
    %184 = arith.addf %182, %183 : vector<8x32xf32>
    %c0_100 = arith.constant 0 : index
    %c0_101 = arith.constant 0 : index
    %185 = vector.load %arg15[%c0_100, %c0_101] : memref<32x64xf32, #tpu.memory_space<vmem>>, vector<32x64xf32>
    %c0_102 = arith.constant 0 : index
    %c0_103 = arith.constant 0 : index
    %186 = vector.load %arg16[%c0_102, %c0_103] : memref<1x64xf32, #tpu.memory_space<vmem>>, vector<1x64xf32>
    %c0_104 = arith.constant 0 : index
    %c0_105 = arith.constant 0 : index
    %187 = vector.load %arg17[%c0_104, %c0_105] : memref<64x32xf32, #tpu.memory_space<vmem>>, vector<64x32xf32>
    %c0_106 = arith.constant 0 : index
    %c0_107 = arith.constant 0 : index
    %188 = vector.load %arg18[%c0_106, %c0_107] : memref<1x32xf32, #tpu.memory_space<vmem>>, vector<1x32xf32>
    %cst_108 = arith.constant dense<0.000000e+00> : vector<8x64xf32>
    %189 = tpu.matmul %184, %185, %cst_108 {dimension_numbers = #tpu.dot_dimension_numbers<[1], [0], [0], [1], [0, 0, 1, 1], [], []>} : vector<8x32xf32>, vector<32x64xf32>, vector<8x64xf32> -> vector<8x64xf32>
    %190 = vector.broadcast %186 : vector<1x64xf32> to vector<8x64xf32>
    %191 = arith.addf %189, %190 : vector<8x64xf32>
    %cst_109 = arith.constant 0.000000e+00 : f32
    %192 = vector.broadcast %cst_109 : f32 to vector<8x64xf32>
    %193 = arith.maximumf %191, %192 : vector<8x64xf32>
    %cst_110 = arith.constant dense<0.000000e+00> : vector<8x32xf32>
    %194 = tpu.matmul %193, %187, %cst_110 {dimension_numbers = #tpu.dot_dimension_numbers<[1], [0], [0], [1], [0, 0, 1, 1], [], []>} : vector<8x64xf32>, vector<64x32xf32>, vector<8x32xf32> -> vector<8x32xf32>
    %195 = vector.broadcast %188 : vector<1x32xf32> to vector<8x32xf32>
    %196 = arith.addf %194, %195 : vector<8x32xf32>
    %197 = arith.addf %159, %196 : vector<8x32xf32>
    %c0_111 = arith.constant 0 : index
    %c0_112 = arith.constant 0 : index
    %c0_113 = arith.constant 0 : index
    %198 = vector.load %arg19[%c0_111, %c0_112, %c0_113] : memref<1x8x32xf32, #tpu.memory_space<vmem>>, vector<1x8x32xf32>
    %199 = vector.shape_cast %198 : vector<1x8x32xf32> to vector<8x32xf32>
    %200 = vector.shape_cast %197 : vector<8x32xf32> to vector<1x8x32xf32>
    tpu.vector_store %arg19[%c0_111, %c0_112, %c0_113], %200 {strides = array<i32>} : memref<1x8x32xf32, #tpu.memory_space<vmem>>, vector<1x8x32xf32>,
    return
  }
  func.func @transform_0(%arg0: i32) -> (i32, i32, i32) {
    %c0_i32 = arith.constant 0 : i32
    %c0_i32_0 = arith.constant 0 : i32
    %c0_i32_1 = arith.constant 0 : i32
    return %arg0, %c0_i32, %c0_i32_0 : i32, i32, i32
  }
  func.func @transform_1(%arg0: i32) -> (i32, i32, i32) {
    %c0_i32 = arith.constant 0 : i32
    %c0_i32_0 = arith.constant 0 : i32
    %c0_i32_1 = arith.constant 0 : i32
    return %arg0, %c0_i32, %c0_i32_0 : i32, i32, i32
  }
  func.func @transform_2(%arg0: i32) -> (i32, i32, i32) {
    %c0_i32 = arith.constant 0 : i32
    %c0_i32_0 = arith.constant 0 : i32
    %c0_i32_1 = arith.constant 0 : i32
    return %arg0, %c0_i32, %c0_i32_0 : i32, i32, i32
  }
  func.func @transform_3(%arg0: i32) -> (i32, i32, i32) {
    %c0_i32 = arith.constant 0 : i32
    %c0_i32_0 = arith.constant 0 : i32
    %c0_i32_1 = arith.constant 0 : i32
    return %arg0, %c0_i32, %c0_i32_0 : i32, i32, i32
  }
  func.func @transform_4(%arg0: i32) -> (i32, i32) {
    %c0_i32 = arith.constant 0 : i32
    %c0_i32_0 = arith.constant 0 : i32
    %c0_i32_1 = arith.constant 0 : i32
    return %c0_i32, %c0_i32_0 : i32, i32
  }
  func.func @transform_5(%arg0: i32) -> (i32, i32) {
    %c0_i32 = arith.constant 0 : i32
    %c0_i32_0 = arith.constant 0 : i32
    %c0_i32_1 = arith.constant 0 : i32
    return %c0_i32, %c0_i32_0 : i32, i32
  }
  func.func @transform_6(%arg0: i32) -> (i32, i32, i32) {
    %c0_i32 = arith.constant 0 : i32
    %c0_i32_0 = arith.constant 0 : i32
    %c0_i32_1 = arith.constant 0 : i32
    %c0_i32_2 = arith.constant 0 : i32
    return %c0_i32, %c0_i32_0, %c0_i32_1 : i32, i32, i32
  }
  func.func @transform_7(%arg0: i32) -> (i32, i32, i32) {
    %c0_i32 = arith.constant 0 : i32
    %c0_i32_0 = arith.constant 0 : i32
    %c0_i32_1 = arith.constant 0 : i32
    %c0_i32_2 = arith.constant 0 : i32
    return %c0_i32, %c0_i32_0, %c0_i32_1 : i32, i32, i32
  }
  func.func @transform_8(%arg0: i32) -> (i32, i32) {
    %c0_i32 = arith.constant 0 : i32
    %c0_i32_0 = arith.constant 0 : i32
    %c0_i32_1 = arith.constant 0 : i32
    return %c0_i32, %c0_i32_0 : i32, i32
  }
  func.func @transform_9(%arg0: i32) -> (i32, i32) {
    %c0_i32 = arith.constant 0 : i32
    %c0_i32_0 = arith.constant 0 : i32
    %c0_i32_1 = arith.constant 0 : i32
    return %c0_i32, %c0_i32_0 : i32, i32
  }
  func.func @transform_10(%arg0: i32) -> (i32, i32, i32) {
    %c0_i32 = arith.constant 0 : i32
    %c0_i32_0 = arith.constant 0 : i32
    %c0_i32_1 = arith.constant 0 : i32
    %c0_i32_2 = arith.constant 0 : i32
    return %c0_i32, %c0_i32_0, %c0_i32_1 : i32, i32, i32
  }
  func.func @transform_11(%arg0: i32) -> (i32, i32, i32) {
    %c0_i32 = arith.constant 0 : i32
    %c0_i32_0 = arith.constant 0 : i32
    %c0_i32_1 = arith.constant 0 : i32
    %c0_i32_2 = arith.constant 0 : i32
    return %c0_i32, %c0_i32_0, %c0_i32_1 : i32, i32, i32
  }
  func.func @transform_12(%arg0: i32) -> (i32, i32) {
    %c0_i32 = arith.constant 0 : i32
    %c0_i32_0 = arith.constant 0 : i32
    %c0_i32_1 = arith.constant 0 : i32
    return %c0_i32, %c0_i32_0 : i32, i32
  }
  func.func @transform_13(%arg0: i32) -> (i32, i32) {
    %c0_i32 = arith.constant 0 : i32
    %c0_i32_0 = arith.constant 0 : i32
    %c0_i32_1 = arith.constant 0 : i32
    return %c0_i32, %c0_i32_0 : i32, i32
  }
  func.func @transform_14(%arg0: i32) -> (i32, i32) {
    %c0_i32 = arith.constant 0 : i32
    %c0_i32_0 = arith.constant 0 : i32
    %c0_i32_1 = arith.constant 0 : i32
    return %c0_i32, %c0_i32_0 : i32, i32
  }
  func.func @transform_15(%arg0: i32) -> (i32, i32) {
    %c0_i32 = arith.constant 0 : i32
    %c0_i32_0 = arith.constant 0 : i32
    %c0_i32_1 = arith.constant 0 : i32
    return %c0_i32, %c0_i32_0 : i32, i32
  }
  func.func @transform_16(%arg0: i32) -> (i32, i32) {
    %c0_i32 = arith.constant 0 : i32
    %c0_i32_0 = arith.constant 0 : i32
    %c0_i32_1 = arith.constant 0 : i32
    return %c0_i32, %c0_i32_0 : i32, i32
  }
  func.func @transform_17(%arg0: i32) -> (i32, i32) {
    %c0_i32 = arith.constant 0 : i32
    %c0_i32_0 = arith.constant 0 : i32
    %c0_i32_1 = arith.constant 0 : i32
    return %c0_i32, %c0_i32_0 : i32, i32
  }
  func.func @transform_18(%arg0: i32) -> (i32, i32, i32) {
    %c0_i32 = arith.constant 0 : i32
    %c0_i32_0 = arith.constant 0 : i32
    %c0_i32_1 = arith.constant 0 : i32
    return %arg0, %c0_i32, %c0_i32_0 : i32, i32, i32
  }
}

</mosaic_0001>

<bundles_post_ra>
// kernel: decoder_layer.1
= control target key start
LH: loop header
LB: loop body
LE: loop exit
PB: predicated region body
PF: predicated region fallthrough
CT: control target
= control target key end

     0   :  { %s3982_s0 = inlined_call_operand.hbm [shape: f32[2,8,32], index: 0, kind: input, shape index: {}, may-alias: {0,18}]   ;;  %s3983_s1 = inlined_call_operand.vmem [shape: f32[2,10,32], index: 1, kind: input, shape index: {}]   ;;  %s3984_s2 = inlined_call_operand.vmem [shape: f32[2,8,8], index: 2, kind: input, shape index: {}]   ;;  %s3985_s3 = inlined_call_operand.vmem [shape: f32[2,8,10], index: 3, kind: input, shape index: {}]   ;;  %s3986_s4 = inlined_call_operand.vmem [shape: f32[1,32], index: 4, kind: input, shape index: {}]   ;;  %s3987_s5 = inlined_call_operand.vmem [shape: f32[1,32], index: 5, kind: input, shape index: {}]   ;;  %s3988_s6 = inlined_call_operand.vmem [shape: f32[4,32,32], index: 6, kind: input, shape index: {}]   ;;  %s3989_s7 = inlined_call_operand.vmem [shape: f32[4,1,32], index: 7, kind: input, shape index: {}]   ;;  %s3990_s8 = inlined_call_operand.vmem [shape: f32[1,32], index: 8, kind: input, shape index: {}]   ;;  %s3991_s9 = inlined_call_operand.vmem [shape: f32[1,32], index: 9, kind: input, shape index: {}]   ;;  %s3992_s10 = inlined_call_operand.vmem [shape: f32[4,32,32], index: 10, kind: input, shape index: {}]   ;;  %s3993_s11 = inlined_call_operand.vmem [shape: f32[4,1,32], index: 11, kind: input, shape index: {}]   ;;  %s3994_s12 = inlined_call_operand.vmem [shape: f32[1,32], index: 12, kind: input, shape index: {}]   ;;  %s3995_s13 = inlined_call_operand.vmem [shape: f32[1,32], index: 13, kind: input, shape index: {}]   ;;  %s3996_s14 = inlined_call_operand.vmem [shape: f32[32,64], index: 14, kind: input, shape index: {}]   ;;  %s3997_s15 = inlined_call_operand.vmem [shape: f32[1,64], index: 15, kind: input, shape index: {}]   ;;  %s3998_s16 = inlined_call_operand.vmem [shape: f32[64,32], index: 16, kind: input, shape index: {}]   ;;  %s3999_s17 = inlined_call_operand.vmem [shape: f32[1,32], index: 17, kind: input, shape index: {}]   ;;  %s4000_s18 = inlined_call_operand.hbm [shape: f32[2,8,32], index: 18, kind: output, shape index: {}, may-alias: {0,18}]  }
   0x1   :  { %4019 = sst [smem:[#allocation14_spill]] %s3982_s0 }
   0x2   :  { %4020 = sst [smem:[#allocation15_spill]] %s3983_s1 }
   0x3   :  { %4021 = sst [smem:[#allocation16_spill]] %s3984_s2 }
   0x4   :  { %4022 = sst [smem:[#allocation17_spill]] %s3994_s12 }
   0x5   :  { %4023 = sst [smem:[#allocation18_spill]] %s3995_s13 }
   0x6   :  { %4024 = sst [smem:[#allocation19_spill]] %s3997_s15 }
   0x7   :  { %4025 = sst [smem:[#allocation20_spill]] %s3999_s17 }
   0x8   :  { %4026 = sst [smem:[#allocation21_spill]] %s4000_s18 }
   0x9   :  { %23 = vsyncpa [#allocation3], 0 }
   0xa   :  { %25 = vsyncpa [#allocation3 + $0x1], 0 }
   0xb   :  { %26 = vsyncpa [#allocation4], 0 }
   0xc   :  { %28 = vsyncpa [#allocation4 + $0x1], 0  ;;  %s3401_s27 = smov 0   ;;  %s3403_s28 = smov 0  }
   0xd   :  { %s3405_s29 = smov 0   ;;  %s3407_s30 = smov 0  }
   0xe LB: > { %4027 = sst [smem:[#allocation8_spill]] %s3282_s27  ;;  %s3422_s0 = sadd.s32 4294967295, %s3294_s30   ;;  %s3294_s30 = sphi %s3407_s30, %s4058_s30   ;;  %s3290_s29 = sphi %s3405_s29, %s4060_s29   ;;  %s3286_s28 = sphi %s3403_s28, %s4062_s28   ;;  %s3282_s27 = sphi %s3401_s27, %s4061_s27  }
   0xf   : > { %4028 = sst [smem:[#allocation9_spill]] %s3290_s29  ;;  %s2954_s19 = sadd.s32 4294967294, %s3294_s30  }
  0x10   : > { %s3426_s1 = sadd.s32 1, %s3294_s30   ;;  %s41_s20 = sadd.s32 1, %s3290_s29 }
  0x11   : > { %4029 = sst [smem:[#allocation10_spill]] %s3426_s1  ;;  %s38_s21 = ssub.s32 %s3294_s30, %s3426_s1 }
  0x12   : > { %p48_p0 = scmp.ne.s32.totalorder %s3290_s29, %s3286_s28  ;;  %p39_p1 = scmp.eq.s32.totalorder %s38_s21, 0 }
  0x13   : > { %p49_p2 = scmp.eq.s32.totalorder %s3294_s30, 0  ;;  %p54_p3 = scmp.ne.s32.totalorder %s3286_s28, %s3282_s27 }
  0x14   : > { %p55_p4 = scmp.eq.s32.totalorder %s3422_s0, 0  ;;  %p450_p7 = scmp.eq.s32.totalorder %s3422_s0, 1 }
  0x15   : > { %s3438_s22 = scalar_select %p39_p1, %s3290_s29, %s41_s20  }
  0x16   : > { %p3440_p5 = por %p49_p2, %p48_p0  ;;  %p3444_p6 = por %p55_p4, %p54_p3 }
  0x17   : > { %4030 = sst [smem:[#allocation11_spill]] %s3438_s22  ;;  %p456_p8 = scmp.eq.s32.totalorder %s2954_s19, 1 }
  0x18   : > { %p3049_p10 = scmp.lt.s32.totalorder %s3294_s30, 2  ;;  %p3451_p11 = por %p450_p7, %p48_p0 }
  0x19   : > { %p3455_p12 = por %p456_p8, %p54_p3  ;;  %s518_s26 = sand.u32 1, %s3290_s29  }
  0x1a   : > { %s4033_s24 = scalar_select %p3451_p11, 1, 0 }
  0x1b   : > { %s4035_s25 = scalar_select %p3455_p12, 1, 0 }
  0x1c   : > { %4034 = sst [smem:[#allocation12_spill]] %s4033_s24  ;;  %s2958_s20 = sshll.u32 %s3294_s30, 3 }
  0x1d   : > { %4036 = sst [smem:[#allocation13_spill]] %s4035_s25  ;;  %s2957_s21 = sshll.u32 %s518_s26, 3 }
  0x1e   : > { %s4037_s27 = sld [smem:[#allocation14_spill]]  ;;  %s522_s19 = scalar_lea.vmem [#allocation2], %s2957_s21 }
  0x1f   : > { %s530_s13 = sshll.u32 %s522_s19, 4  ;;  %p3466_p13 = pnand %p3049_p10, %p3440_p5  ;;  %s531_s13 = int_to_ptr.vmem [resolvable:$true] %s530_s13 }
  0x20   : > { %p2959_p0 = scmp.ge.s32.totalorder %s3294_s30, 1  ;;  %p557_p1 = scmp.lt.s32.totalorder %s3294_s30, 3 }
  0x21   : > { %s519_s29 = scalar_lea.sflag [#allocation3], %s518_s26  ;;  %p3202_p3 = pneg %p3466_p13 }
  0x24   : > { %s4038_s18 = smov %s4037_s27  ;;  %s526_s17 = scalar_lea.hbm %s4037_s27, %s2958_s20 }
  0x25   : > { %s528_s15 = sshll.u32 %s526_s17, 4  ;;  %s3205_s1 = scalar_lea.hbm %s4038_s18, 16  ;;  %s529_s15 = int_to_ptr.hbm [resolvable:$true] %s528_s15 }
  0x26   : > { %s3198_s25 = sshra.s32 %s529_s15, 4  ;;  %s3199_s25 = int_to_ptr.hbm [resolvable:$true] %s3198_s25 }
  0x27   : > { %s3200_s24 = scalar_lea.hbm %s3199_s25, 8  ;;  %p3206_p5 = scmp.lt.s32.totalorder %s3199_s25, %s4038_s18 }
  0x28   : > { %p3201_p2 = scmp.ne.s32.totalorder %s3199_s25, %s3200_s24  ;;  %p3207_p8 = scmp.lt.s32.totalorder %s3205_s1, %s3200_s24 }
  0x2a   : > { %p3203_p4 = pnand %p3202_p3, %p3201_p2  ;;  %p3208_p10 = por %p3207_p8, %p3206_p5 }
  0x2c   : > { %p3204_p7 = pneg %p3203_p4 }
  0x2e   : > { %p3209_p9 = pnand %p3208_p10, %p3204_p7 }
  0x30   : > { %3212 = shalt.err (!%p3209_p9)
}
  0x31   : > { %3044 = dma.hbm_to_vmem [thread:$0]  (!%p3466_p13), %s529_s15, 128, %s531_s13, %s519_s29  }
  0x32   : > { %p558_p2 = pnand %p2959_p0, %p557_p1 }
  0x33   : > { %s3487_s26 = sand.u32 (!%p558_p2), 1, %s3286_s28  }
  0x34   : > { %561 = sbr.rel (%p558_p2) target bundleno = 4146 (0x1032), region = 92  ;;  %s4010_s24 = sshll.u32 (!%p558_p2), %s3487_s26, 3 }
  0x35   : > { %s564_s25 = scalar_lea.sflag (!%p558_p2), [#allocation3], %s3487_s26  ;;  %s567_s20 = scalar_lea.vmem (!%p558_p2), [#allocation2], %s4010_s24 }
  0x39   : > { %3273 = dma.done.wait (%p3444_p6), %s564_s25, 128  }
  0x3a   : > { %3275 = vsyncadd (%p3444_p6), %s564_s25, 4294967168  ;;  %vm654_vm0 = vcmask 261120   ;;  %v3497_v0 = vld [vmem:[%s567_s20] sm:$0xff]  ;;  %v3296_v2 = vmov 32.0   ;;  %v3297_v14 = vmov 31.0   ;;  %v718_v18 = vld [vmem:[%s3988_s6 + $0x18] sm:$0xff] }
  0x3b   : > { %v655_v1 = vsel %vm654_vm0, %v3497_v0, 0.0  ;;  %3150 = vrcp.f32 %v3296_v2  ;;  %v2969_v19 = vld [vmem:[%s3988_s6 + $0x38] sm:$0xff]  ;;  %759 = vmatpush.msra.mxu0 %v718_v18  ;;  %v717_v21 = vld [vmem:[%s3988_s6 + $0x10] sm:$0xff]  ;;  %v716_v25 = vld [vmem:[%s3988_s6 + $0x8] sm:$0xff]  ;;  %s4015_s23 = smov 104   ;;  %s3299_s21 = smov 120  }
  0x3c   : > { %656 = vadd.xlane.f32.xlu0 %v655_v1  ;;  %3152 = vrcp.f32 %v3297_v14  ;;  %v2973_v20 = vld [vmem:[%s3988_s6 + $0x58] sm:$0xff]  ;;  %782 = vmatpush.msra.mxu1 %v2969_v19  ;;  %v2968_v22 = vld [vmem:[%s3988_s6 + $0x30] sm:$0xff]  ;;  %v2967_v26 = vld [vmem:[%s3988_s6 + $0x28] sm:$0xff]  ;;  %s4017_s19 = smov 112   ;;  %vm968_vm9 = vcmask 64512   ;;  %p634_p6 = scmp.lt.s32.totalorder %s3422_s0, 1 }
  0x3d   : > { %v2972_v23 = vld [vmem:[%s3988_s6 + $0x50] sm:$0xff]  ;;  %805 = vmatpush.msra.mxu2 %v2973_v20  ;;  %760 = vmatpush.msra.mxu0 %v717_v21  ;;  %v2971_v27 = vld [vmem:[%s3988_s6 + $0x48] sm:$0xff]  ;;  %v715_v28 = vld [vmem:[%s3988_s6] sm:$0xff]  ;;  %s4040_s2 = sld [smem:[#allocation16_spill]]  ;;  %s4013_s13 = smov 16  }
  0x3e   : > { %783 = vmatpush.msra.mxu1 %v2968_v22  ;;  %v2966_v29 = vld [vmem:[%s3988_s6 + $0x20] sm:$0xff]  ;;  %s3577_s17 = scalar_select %p634_p6, %s3422_s0, 1 }
  0x3f   : > { %806 = vmatpush.msra.mxu2 %v2972_v23  ;;  %761 = vmatpush.msra.mxu0 %v716_v25  ;;  %v2970_v30 = vld [vmem:[%s3988_s6 + $0x40] sm:$0xff]  ;;  %s4011_s15 = smov 24   ;;  %s4012_s29 = smov 8  }
  0x40   : > { %784 = vmatpush.msra.mxu1 %v2967_v26  ;;  %v3134_v50 = vld [vmem:[%s3986_s4] ss:$0 sm:$0xff]  ;;  %v3137_v62 = vld [vmem:[%s3989_s7 + $0x1] ss:$0 sm:$0xff]  ;;  %s4014_s27 = sshll.u32 %s3577_s17, 3  ;;  %s3036_s1 = sshll.u32 %s3577_s17, 4 }
  0x41   : > { %v3151_v3 = vpop.eup %3150  ;;  %807 = vmatpush.msra.mxu2 %v2971_v27  ;;  %762 = vmatpush.msra.mxu0 %v715_v28  ;;  %v3135_v57 = vld [vmem:[%s3987_s5] ss:$0 sm:$0xff]  ;;  %s4042_s12 = smov 112   ;;  %s4043_s22 = smov 104  }
  0x42   : > { %v659_v4 = vmul.f32 32.0, %v3151_v3  ;;  %vm663_vm1 = vweird.f32 %v3151_v3  ;;  %v3153_v15 = vpop.eup %3152  ;;  %785 = vmatpush.msra.mxu1 %v2966_v29  ;;  %v3136_v61 = vld [vmem:[%s3989_s7] ss:$0 sm:$0xff] }
  0x43   : > { %v672_v16 = vmul.f32 31.0, %v3153_v15  ;;  %vm676_vm2 = vweird.f32 %v3153_v15  ;;  %808 = vmatpush.msra.mxu2 %v2970_v30  ;;  %s642_s25 = scalar_lea.vmem %s4040_s2, %s4014_s27 }
  0x44   : > { %v660_v5 = vsub.f32 1.0, %v659_v4  ;;  %v650_v18 = vld [vmem:[%s642_s25] sm:$0xff]  ;;  %s4051_s25 = sld [smem:[#allocation20_spill]] }
  0x45   : > { %v673_v17 = vsub.f32 1.0, %v672_v16 }
  0x46   : > { %v661_v6 = vmul.f32 %v3151_v3, %v660_v5 }
  0x47   : > { %v674_v24 = vmul.f32 %v3153_v15, %v673_v17 }
  0x48   : > { %v662_v7 = vadd.f32 %v3151_v3, %v661_v6 }
  0x49   : > { %v675_v31 = vadd.f32 %v3153_v15, %v674_v24 }
  0x4a   : > { %v3501_v8 = vsel %vm663_vm1, %v3151_v3, %v662_v7 }
  0x4b   : > { %v3546_v32 = vsel %vm676_vm2, %v3153_v15, %v675_v31 }
  0xaf   : > { %v657_v9 = vpop.xlane.xlu0 %656 }
  0xb0   : > { %v665_v10 = vmul.f32 %v3501_v8, %v657_v9 }
  0xb2   : > { %v3505_v11 = vsub.f32 %v3497_v0, %v665_v10 }
  0xb4   : > { %v667_v12 = vmul.f32 %v3505_v11, %v3505_v11  ;;  %v709_v55 = vmul.f32 %v3134_v50, %v3505_v11 }
  0xb6   : > { %v668_v13 = vsel %vm654_vm0, %v667_v12, 0.0 }
  0xb7   : > { %669 = vadd.xlane.f32.xlu0 %v668_v13 }
 0x12a   : > { %v670_v33 = vpop.xlane.xlu0 %669 }
 0x12b   : > { %v678_v34 = vmul.f32 %v3546_v32, %v670_v33 }
 0x12d   : > { %3154 = vrsqrt.f32 %v678_v34  ;;  %vm686_vm3 = vcmp.eq.f32.partialorder %v678_v34, inf  ;;  %v689_v42 = vand.u32 2147483648, %v678_v34  ;;  %vm688_vm4 = vcmp.eq.f32.partialorder %v678_v34, 0.0 }
 0x133   : > { %v3155_v35 = vpop.eup %3154 }
 0x134   : > { %v680_v36 = vmul.f32 %v3155_v35, %v678_v34 }
 0x136   : > { %v681_v37 = vmul.f32 %v3155_v35, %v680_v36 }
 0x138   : > { %v682_v38 = vmul.f32 0.5, %v681_v37 }
 0x13a   : > { %v683_v39 = vsub.f32 1.5, %v682_v38 }
 0x13c   : > { %v684_v40 = vmul.f32 %v3155_v35, %v683_v39  ;;  %v3138_v35 = vld [vmem:[%s3989_s7 + $0x2] ss:$0 sm:$0xff] }
 0x13e   : > { %v685_v41 = vmul.f32 %v684_v40, %v678_v34 }
 0x140   : > { %v687_v43 = vsel %vm686_vm3, %v678_v34, %v685_v41 }
 0x141   : > { %v690_v44 = vsel %vm688_vm4, %v689_v42, %v687_v43 }
 0x142   : > { %v691_v45 = vadd.f32 1e-06, %v690_v44 }
 0x144   : > { %3156 = vrcp.f32 %v691_v45  ;;  %v703_v49 = vand.u32 2147483648, %v691_v45  ;;  %v701_v52 = vand.u32 2147483647, %v691_v45  ;;  %vm697_vm6 = vweird.f32 %v691_v45 }
 0x146   : > { %v704_v54 = vor.u32 1.1754944e-38, %v703_v49  ;;  %vm702_vm8 = vcmp.eq.f32.partialorder %v701_v52, 8.507059e+37 }
 0x14a   : > { %v3157_v46 = vpop.eup %3156 }
 0x14b   : > { %v693_v47 = vmul.f32 %v3157_v46, %v691_v45  ;;  %vm698_vm5 = vweird.f32 %v3157_v46 }
 0x14c   : > { %vm699_vm7 = vmor %vm697_vm6, %vm698_vm5 }
 0x14d   : > { %v694_v48 = vsub.f32 1.0, %v693_v47 }
 0x14f   : > { %v695_v51 = vmul.f32 %v3157_v46, %v694_v48 }
 0x151   : > { %v696_v53 = vadd.f32 %v3157_v46, %v695_v51 }
 0x153   : > { %v700_v56 = vsel %vm699_vm7, %v3157_v46, %v696_v53 }
 0x154   : > { %v705_v58 = vsel %vm702_vm8, %v704_v54, %v700_v56 }
 0x155   : > { %v710_v59 = vmul.f32 %v709_v55, %v705_v58 }
 0x157   : > { %v714_v60 = vadd.f32 %v3135_v57, %v710_v59 }
 0x159   : > { %2981 = vmatmul.msk.f32.vlgmr.msra.gmra.mxu0 %vm654_vm0, %v714_v60  ;;  %2982 = vmatmul.msk.f32.vlgmr.msra.gmra.mxu1 %vm654_vm0, %v714_v60 }
 0x15a   : > { %2983 = vmatmul.msk.f32.vlgmr.msra.gmra.mxu2 %vm654_vm0, %v714_v60 }
 0x1d6   : > { %v764_v63 = vpop.f32.mrf.mxu0  ;;  %v787_v1 = vpop.f32.mrf.mxu1 }
 0x1d7   : > { %v765_v2 = vadd.f32 %v3136_v61, %v764_v63  ;;  %v788_v3 = vadd.f32 %v3137_v62, %v787_v1 }
 0x1d9   : > { %827 = vrot.lane.b32.xlu2 %v788_v3, %s4015_s23  ;;  %821 = vrot.lane.b32.xlu1 %v788_v3, %s3299_s21 }
 0x1da   : > { %816 = vrot.lane.b32.xlu0 %v765_v2, %s4017_s19 }
 0x1dd   : > { %v810_v36 = vpop.f32.mrf.mxu2 }
 0x1de   : > { %v811_v37 = vadd.f32 %v3138_v35, %v810_v36 }
 0x1e1   : > { %824 = vrot.lane.b32.xlu1 %v788_v3, %s4017_s19  ;;  %814 = vrot.lane.b32.xlu2 %v765_v2, %s3299_s21 }
 0x1e9   : > { %818 = vrot.lane.b32.xlu1 %v765_v2, %s4015_s23 }
 0x207   : > { %840 = vxpose.xlu2.b32.start.end [1/1] (short) (narrow) %v788_v3, 8 }
 0x233   : > { %v828_v5 = vpop.permute.xlu2 %827 }
 0x23b   : > { %v815_v9 = vpop.permute.xlu2 %814 }
 0x24b   : > { %v822_v4 = vpop.permute.xlu1 %821 }
 0x24c   : > { %872 = vxpose.xlu1.b32.start.end [1/1] (short) (narrow) %v822_v4, 8  ;;  %v817_v13 = vpop.permute.xlu0 %816 }
 0x253   : > { %v825_v6 = vpop.permute.xlu1 %824 }
 0x254   : > { %v3094_v7 = vpack.i.bf16 %v828_v5, %v825_v6 }
 0x256   : > { %3095 = vxpose.xlu0.b32.start.end [1/1] (short) (narrow) %v3094_v7, 8 }
 0x25b   : > { %v819_v11 = vpop.permute.xlu1 %818 }
 0x2a0   : > { %v856_v10 = vpop.trf.xlu2 }
 0x2a1   : > { %986 = vmatpush.msra.mxu3 %v856_v10 }
 0x2a2   : > { %2984 = vmatmul.msk.f32.vlgmr.msra.gmra.mxu3 %vm968_vm9, %v765_v2 }
 0x2f0   : > { %v888_v12 = vpop.trf.xlu1 }
 0x2f1   : > { %1008 = vmatpush.msrb.mxu3 %v888_v12 }
 0x2f2   : > { %2985 = vmatmul.msk.f32.vlgmr.msrb.gmra.mxu3 %vm968_vm9, %v815_v9 }
 0x2fa   : > { %v3096_v14 = vpop.trf.xlu0 }
 0x2fb   : > { %v3097_v15 = vunpack.i.l.bf16 %v3096_v14  ;;  %v3100_v16 = vunpack.i.h.bf16 %v3096_v14 }
 0x2fd   : > { %1030 = vmatpush.msrb.mxu0 %v3097_v15  ;;  %1052 = vmatpush.msrb.mxu1 %v3100_v16 }
 0x2fe   : > { %2986 = vmatmul.msk.f32.vlgmr.msrb.gmra.mxu0 %vm968_vm9, %v817_v13  ;;  %2987 = vmatmul.msk.f32.vlgmr.msrb.gmra.mxu1 %vm968_vm9, %v819_v11 }
 0x325   : > { %v988_v17 = vpop.f32.mrf.mxu3 }
 0x326   : > { %v1057_v19 = vmul.f32 0.35355338, %v988_v17 }
 0x328   : > { %v1061_v20 = vadd.f32 %v1057_v19, %v650_v18 }
 0x32a   : > { %v1065_v21 = vsel %vm968_vm9, %v1061_v20, -inf }
 0x32b   : > { %1066 = vmax.xlane.f32.xlu2 %v1065_v21 }
 0x375   : > { %v1010_v22 = vpop.f32.mrf.mxu3 }
 0x376   : > { %v1058_v23 = vmul.f32 0.35355338, %v1010_v22 }
 0x378   : > { %v1062_v24 = vadd.f32 %v1058_v23, %v650_v18 }
 0x37a   : > { %v1068_v25 = vsel %vm968_vm9, %v1062_v24, -inf }
 0x37b   : > { %v1032_v26 = vpop.f32.mrf.mxu0  ;;  %v1054_v27 = vpop.f32.mrf.mxu1  ;;  %1069 = vmax.xlane.f32.xlu0 %v1068_v25 }
 0x37c   : > { %v1059_v28 = vmul.f32 0.35355338, %v1032_v26  ;;  %v1060_v29 = vmul.f32 0.35355338, %v1054_v27 }
 0x37e   : > { %v1063_v30 = vadd.f32 %v1059_v28, %v650_v18  ;;  %v1064_v31 = vadd.f32 %v1060_v29, %v650_v18 }
 0x380   : > { %v1071_v33 = vsel %vm968_vm9, %v1063_v30, -inf  ;;  %v1074_v34 = vsel %vm968_vm9, %v1064_v31, -inf }
 0x381   : > { %1072 = vmax.xlane.f32.xlu1 %v1071_v33  ;;  %1075 = vmax.xlane.f32.xlu2 %v1074_v34 }
 0x38f   : > { %837 = vrot.lane.b32.xlu0 %v811_v37, %s4015_s23  ;;  %s4052_s23 = sld [smem:[#allocation21_spill]] }
 0x399   : > { %831 = vrot.lane.b32.xlu2 %v811_v37, %s3299_s21 }
 0x39a   : > { %834 = vrot.lane.b32.xlu1 %v811_v37, %s4017_s19 }
 0x39e   : > { %v1067_v38 = vpop.xlane.xlu2 %1066 }
 0x39f   : > { %v1077_v39 = vsub.f32 %v1061_v20, %v1067_v38 }
 0x3a1   : > { %v1081_v40 = vmul.f32 1.442695, %v1077_v39 }
 0x3a3   : > { %3158 = vpow2.f32 %v1081_v40 }
 0x3a9   : > { %v3159_v41 = vpop.eup %3158 }
 0x3aa   : > { %v1089_v42 = vsel %vm968_vm9, %v3159_v41, 0.0 }
 0x3c4   : > { %1090 = vadd.xlane.f32.xlu1 %v1089_v42 }
 0x3ee   : > { %v1070_v43 = vpop.xlane.xlu0 %1069 }
 0x3ef   : > { %v1078_v44 = vsub.f32 %v1062_v24, %v1070_v43 }
 0x3f1   : > { %v1083_v45 = vmul.f32 1.442695, %v1078_v44 }
 0x3f3   : > { %3160 = vpow2.f32 %v1083_v45 }
 0x3f4   : > { %v1073_v46 = vpop.xlane.xlu1 %1072  ;;  %v1076_v47 = vpop.xlane.xlu2 %1075 }
 0x3f5   : > { %v1079_v48 = vsub.f32 %v1063_v30, %v1073_v46  ;;  %v1080_v49 = vsub.f32 %v1064_v31, %v1076_v47 }
 0x3f7   : > { %v1085_v50 = vmul.f32 1.442695, %v1079_v48  ;;  %v1087_v51 = vmul.f32 1.442695, %v1080_v49 }
 0x3f9   : > { %v3596_v52 = vpop.eup %3160  ;;  %3162 = vpow2.f32 %v1085_v50 }
 0x3fa   : > { %3164 = vpow2.f32 %v1087_v51  ;;  %v1092_v53 = vsel %vm968_vm9, %v3596_v52, 0.0 }
 0x3fb   : > { %1093 = vadd.xlane.f32.xlu2 %v1092_v53 }
 0x3fc   : > { %v832_v58 = vpop.permute.xlu2 %831 }
 0x3ff   : > { %v3600_v54 = vpop.eup %3162 }
 0x400   : > { %v3602_v55 = vpop.eup %3164  ;;  %v1095_v56 = vsel %vm968_vm9, %v3600_v54, 0.0 }
 0x401   : > { %1096 = vadd.xlane.f32.xlu1 %v1095_v56  ;;  %v1098_v57 = vsel %vm968_vm9, %v3602_v55, 0.0  ;;  %v838_v60 = vpop.permute.xlu0 %837 }
 0x402   : > { %1099 = vadd.xlane.f32.xlu0 %v1098_v57  ;;  %v3301_v57 = vmov 1983009808  }
 0x40c   : > { %v835_v59 = vpop.permute.xlu1 %834 }
 0x424   : > { %1161 = vxpose.xlu2.b32.start.end [1/1] (short) (narrow) %v811_v37, 8 }
 0x42b   : > { %1193 = vxpose.xlu0.b32.start.end [1/1] (short) (narrow) %v832_v58, 8  ;;  %v1527_v58 = vunpack.c.l.s4 %v3301_v57 }
 0x433   : > { %1257 = vxpose.xlu0.b32.start.end [1/1] (short) (narrow) %v838_v60, 8 }
 0x437   : > { %v1091_v61 = vpop.xlane.xlu1 %1090 }
 0x438   : > { %3166 = vrcp.f32 %v1091_v61  ;;  %v1112_v2 = vand.u32 2147483648, %v1091_v61  ;;  %v1110_v4 = vand.u32 2147483647, %v1091_v61  ;;  %vm1106_vm11 = vweird.f32 %v1091_v61 }
 0x43a   : > { %v1113_v6 = vor.u32 1.1754944e-38, %v1112_v2  ;;  %vm1111_vm13 = vcmp.eq.f32.partialorder %v1110_v4, 8.507059e+37  ;;  %v3302_v4 = vmov 1934713408  }
 0x43b   : > { %1225 = vxpose.xlu1.b32.start.end [1/1] (short) (narrow) %v835_v59, 8 }
 0x43e   : > { %v3167_v62 = vpop.eup %3166 }
 0x43f   : > { %v1102_v63 = vmul.f32 %v3167_v62, %v1091_v61  ;;  %vm1107_vm10 = vweird.f32 %v3167_v62 }
 0x440   : > { %vm1108_vm12 = vmor %vm1106_vm11, %vm1107_vm10 }
 0x441   : > { %v1103_v1 = vsub.f32 1.0, %v1102_v63 }
 0x443   : > { %v1104_v3 = vmul.f32 %v3167_v62, %v1103_v1 }
 0x445   : > { %v1105_v5 = vadd.f32 %v3167_v62, %v1104_v3 }
 0x447   : > { %v1109_v7 = vsel %vm1108_vm12, %v3167_v62, %v1105_v5  ;;  %vm1522_vm12 = vcmask 1047556   ;;  %v3619_v62 = vunpack.c.0.s8 %v1527_v58  ;;  %v1551_v5 = vunpack.c.l.s4 %v3302_v4 }
 0x448   : > { %v1114_v9 = vsel %vm1111_vm13, %v1113_v6, %v1109_v7  ;;  %vm1645_vm13 = vcmask 130048  }
 0x449   : > { %v1157_v10 = vmul.f32 %v3159_v41, %v1114_v9 }
 0x44b   : > { %2988 = vmatpush.xpose.msk.msra.mxu3 %vm968_vm9, %v1157_v10  ;;  %v3625_v10 = vunpack.c.0.s8 %v1551_v5  ;;  %v2977_v5 = vld [vmem:[%s3988_s6 + $0x78] sm:$0xff] }
 0x44c   : > { %1667 = vmatpush.msrb.mxu2 %v2977_v5  ;;  %v3142_v5 = vld [vmem:[%s3991_s9] ss:$0 sm:$0xff] }
 0x46e   : > { %v1094_v11 = vpop.xlane.xlu2 %1093 }
 0x46f   : > { %3168 = vrcp.f32 %v1094_v11  ;;  %v1126_v17 = vand.u32 2147483648, %v1094_v11  ;;  %v1124_v19 = vand.u32 2147483647, %v1094_v11  ;;  %vm1120_vm15 = vweird.f32 %v1094_v11 }
 0x471   : > { %v1127_v24 = vor.u32 1.1754944e-38, %v1126_v17  ;;  %vm1125_vm2 = vcmp.eq.f32.partialorder %v1124_v19, 8.507059e+37 }
 0x474   : > { %v1097_v12 = vpop.xlane.xlu1 %1096 }
 0x475   : > { %v3169_v13 = vpop.eup %3168  ;;  %3170 = vrcp.f32 %v1097_v12  ;;  %v1100_v14 = vpop.xlane.xlu0 %1099  ;;  %v1138_v29 = vand.u32 2147483647, %v1097_v12  ;;  %v1140_v30 = vand.u32 2147483648, %v1097_v12  ;;  %vm1134_vm5 = vweird.f32 %v1097_v12 }
 0x476   : > { %v1116_v15 = vmul.f32 %v3169_v13, %v1094_v11  ;;  %3172 = vrcp.f32 %v1100_v14  ;;  %vm1121_vm14 = vweird.f32 %v3169_v13  ;;  %v1154_v34 = vand.u32 2147483648, %v1100_v14 }
 0x477   : > { %vm1122_vm1 = vmor %vm1120_vm15, %vm1121_vm14  ;;  %v1152_v37 = vand.u32 2147483647, %v1100_v14  ;;  %v1141_v39 = vor.u32 1.1754944e-38, %v1140_v30  ;;  %vm1148_vm7 = vweird.f32 %v1100_v14  ;;  %vm1139_vm8 = vcmp.eq.f32.partialorder %v1138_v29, 8.507059e+37 }
 0x478   : > { %v1117_v16 = vsub.f32 1.0, %v1116_v15  ;;  %v1155_v42 = vor.u32 1.1754944e-38, %v1154_v34  ;;  %vm1647_vm14 = vcmask 195584  }
 0x479   : > { %vm1153_vm11 = vcmp.eq.f32.partialorder %v1152_v37, 8.507059e+37 }
 0x47a   : > { %v1118_v18 = vmul.f32 %v3169_v13, %v1117_v16 }
 0x47b   : > { %v3171_v20 = vpop.eup %3170 }
 0x47c   : > { %v3173_v21 = vpop.eup %3172  ;;  %v1119_v22 = vadd.f32 %v3169_v13, %v1118_v18  ;;  %v1130_v23 = vmul.f32 %v3171_v20, %v1097_v12  ;;  %vm1135_vm3 = vweird.f32 %v3171_v20 }
 0x47d   : > { %v1144_v25 = vmul.f32 %v3173_v21, %v1100_v14  ;;  %vm1149_vm4 = vweird.f32 %v3173_v21  ;;  %vm1136_vm6 = vmor %vm1134_vm5, %vm1135_vm3 }
 0x47e   : > { %v1123_v26 = vsel %vm1122_vm1, %v3169_v13, %v1119_v22  ;;  %v1131_v27 = vsub.f32 1.0, %v1130_v23  ;;  %vm1150_vm10 = vmor %vm1148_vm7, %vm1149_vm4 }
 0x47f   : > { %v1128_v28 = vsel %vm1125_vm2, %v1127_v24, %v1123_v26  ;;  %v1145_v31 = vsub.f32 1.0, %v1144_v25 }
 0x480   : > { %v1132_v33 = vmul.f32 %v3171_v20, %v1131_v27  ;;  %v1158_v35 = vmul.f32 %v3596_v52, %v1128_v28 }
 0x481   : > { %v1146_v36 = vmul.f32 %v3173_v21, %v1145_v31 }
 0x482   : > { %v1133_v38 = vadd.f32 %v3171_v20, %v1132_v33  ;;  %2990 = vmatpush.xpose.msk.msrb.mxu3 %vm968_vm9, %v1158_v35 }
 0x483   : > { %v1147_v40 = vadd.f32 %v3173_v21, %v1146_v36 }
 0x484   : > { %v1137_v41 = vsel %vm1136_vm6, %v3171_v20, %v1133_v38  ;;  %vm2105_vm6 = vcmask 80896  }
 0x485   : > { %v1142_v43 = vsel %vm1139_vm8, %v1141_v39, %v1137_v41  ;;  %v1151_v44 = vsel %vm1150_vm10, %v3173_v21, %v1147_v40 }
 0x486   : > { %v1156_v45 = vsel %vm1153_vm11, %v1155_v42, %v1151_v44  ;;  %v1159_v46 = vmul.f32 %v3600_v54, %v1142_v43 }
 0x487   : > { %v1160_v47 = vmul.f32 %v3602_v55, %v1156_v45 }
 0x488   : > { %2992 = vmatpush.xpose.msk.msra.mxu0 %vm968_vm9, %v1159_v46 }
 0x489   : > { %2994 = vmatpush.xpose.msk.msra.mxu1 %vm968_vm9, %v1160_v47 }
 0x4bd   : > { %v1177_v48 = vpop.trf.xlu2 }
 0x4be   : > { %2989 = vmatmul.msk.f32.vlgmr.msra.gmra.mxu3 %vm968_vm9, %v1177_v48 }
 0x4cf   : > { %v1209_v49 = vpop.trf.xlu0 }
 0x4d0   : > { %2991 = vmatmul.msk.f32.vlgmr.msrb.gmra.mxu3 %vm968_vm9, %v1209_v49 }
 0x4d7   : > { %v1273_v50 = vpop.trf.xlu0 }
 0x4d8   : > { %2995 = vmatmul.msk.f32.vlgmr.msra.gmra.mxu1 %vm968_vm9, %v1273_v50 }
 0x4df   : > { %v1241_v51 = vpop.trf.xlu1 }
 0x4e0   : > { %2993 = vmatmul.msk.f32.vlgmr.msra.gmra.mxu0 %vm968_vm9, %v1241_v51 }
 0x541   : > { %v1312_v52 = vpop.f32.mrf.mxu3 }
 0x542   : > { %1393 = vxpose.xlu0.b32.start.end [1/1] (short) (narrow) %v1312_v52, 8 }
 0x553   : > { %v1338_v53 = vpop.f32.mrf.mxu3 }
 0x554   : > { %1425 = vxpose.xlu0.b32.start.end [1/1] (short) (narrow) %v1338_v53, 8 }
 0x555   : > { %v1390_v55 = vpop.f32.mrf.mxu1 }
 0x55d   : > { %v1364_v54 = vpop.f32.mrf.mxu0 }
 0x55e   : > { %1457 = vxpose.xlu2.b32.start.end [1/1] (short) (narrow) %v1364_v54, 8 }
 0x566   : > { %1489 = vxpose.xlu2.b32.start.end [1/1] (short) (narrow) %v1390_v55, 8 }
 0x5e6   : > { %v1409_v56 = vpop.trf.xlu0 }
 0x5e7   : > { %v1524_v59 = vrot.slane %v1409_v56, 4 }
 0x5f7   : > { %v1473_v60 = vpop.trf.xlu2 }
 0x5f8   : > { %v1521_v61 = vrot.slane %v1473_v60, 4  ;;  %v1441_v63 = vpop.trf.xlu0  ;;  %v1525_v1 = vsel %vm1522_vm12, %v1473_v60, %v1524_v59 }
 0x5f9   : > { %v1536_v3 = vrot.slane %v1441_v63, 4  ;;  %v1533_v6 = vperm.slane %v1525_v1, %v3619_v62 }
 0x5fa   : > { %v1523_v2 = vsel %vm1522_vm12, %v1521_v61, %v1409_v56 }
 0x5fb   : > { %v1529_v7 = vperm.slane %v1523_v2, %v3619_v62  ;;  %v1560_v13 = vrot.slane %v1533_v6, 4 }
 0x5fd   : > { %v1548_v16 = vrot.slane %v1529_v7, 4 }
 0x5ff   : > { %v1505_v9 = vpop.trf.xlu2 }
 0x600   : > { %v1534_v11 = vrot.slane %v1505_v9, 4  ;;  %v1537_v12 = vsel %vm1522_vm12, %v1505_v9, %v1536_v3  ;;  %v2974_v9 = vld [vmem:[%s3988_s6 + $0x60] sm:$0xff] }
 0x601   : > { %v1545_v14 = vperm.slane %v1537_v12, %v3619_v62 }
 0x602   : > { %v1535_v15 = vsel %vm1522_vm12, %v1534_v11, %v1441_v63 }
 0x603   : > { %v1541_v17 = vperm.slane %v1535_v15, %v3619_v62  ;;  %v1558_v18 = vrot.slane %v1545_v14, 4  ;;  %v1561_v19 = vsel %vm1522_vm12, %v1545_v14, %v1560_v13 }
 0x604   : > { %v1569_v20 = vperm.slane %v1561_v19, %v3625_v10  ;;  %v2998_v19 = vld [vmem:[%s3992_s10 + $0x28] sm:$0xff] }
 0x605   : > { %v1546_v21 = vrot.slane %v1541_v17, 4  ;;  %v1549_v22 = vsel %vm1522_vm12, %v1541_v17, %v1548_v16  ;;  %v1559_v23 = vsel %vm1522_vm12, %v1558_v18, %v1533_v6  ;;  %v2976_v6 = vld [vmem:[%s3988_s6 + $0x70] sm:$0xff]  ;;  %v3000_v17 = vld [vmem:[%s3992_s10 + $0x38] sm:$0xff] }
 0x606   : > { %v1557_v24 = vperm.slane %v1549_v22, %v3625_v10  ;;  %v1565_v25 = vperm.slane %v1559_v23, %v3625_v10  ;;  %v1576_v26 = vrot.slane %v1569_v20, 4  ;;  %1668 = vmatpush.msrb.mxu2 %v2976_v6  ;;  %v2999_v18 = vld [vmem:[%s3992_s10 + $0x30] sm:$0xff]  ;;  %1797 = vmatpush.msrb.mxu0 %v3000_v17  ;;  %v2997_v20 = vld [vmem:[%s3992_s10 + $0x20] sm:$0xff] }
 0x607   : > { %v1547_v27 = vsel %vm1522_vm12, %v1546_v21, %v1529_v7  ;;  %v2975_v7 = vld [vmem:[%s3988_s6 + $0x68] sm:$0xff]  ;;  %v3139_v23 = vld [vmem:[%s3989_s7 + $0x3] ss:$0 sm:$0xff] }
 0x608   : > { %v1553_v28 = vperm.slane %v1547_v27, %v3625_v10  ;;  %v1572_v29 = vrot.slane %v1557_v24, 4  ;;  %v1574_v30 = vrot.slane %v1565_v25, 4  ;;  %v1577_v31 = vsel %vm1522_vm12, 0.0, %v1576_v26  ;;  %1669 = vmatpush.msrb.mxu2 %v2975_v7  ;;  %1798 = vmatpush.msrb.mxu0 %v2999_v18 }
 0x609   : > { %v1589_v33 = vsel %vm1522_vm12, %v1576_v26, %v1565_v25  ;;  %v1594_v34 = vrot.slane %v1577_v31, 4 }
 0x60a   : > { %v1570_v35 = vrot.slane %v1553_v28, 4  ;;  %v1573_v36 = vsel %vm1522_vm12, 0.0, %v1572_v29  ;;  %v1575_v37 = vsel %vm1522_vm12, 0.0, %v1574_v30  ;;  %v1593_v38 = vperm.slane %v1589_v33, %v3619_v62  ;;  %1670 = vmatpush.msrb.mxu2 %v2974_v9  ;;  %1799 = vmatpush.msrb.mxu0 %v2998_v19 }
 0x60b   : > { %v1583_v39 = vrot.slane %v1573_v36, 4  ;;  %v1578_v40 = vsel %vm1522_vm12, %v1572_v29, %v1553_v28  ;;  %v1595_v41 = vsel %vm1522_vm12, %v1594_v34, %v1575_v37  ;;  %v3141_v29 = vld [vmem:[%s3993_s11 + $0x1] ss:$0 sm:$0xff] }
 0x60c   : > { %v1571_v42 = vsel %vm1522_vm12, 0.0, %v1570_v35  ;;  %v1582_v43 = vperm.slane %v1578_v40, %v3619_v62  ;;  %v1599_v44 = vperm.slane %v1595_v41, %v3619_v62  ;;  %v1614_v45 = vrot.slane %v1593_v38, 4  ;;  %1800 = vmatpush.msrb.mxu0 %v2997_v20  ;;  %v1726_v40 = vld [vmem:[%s3992_s10 + $0x10] sm:$0xff]  ;;  %v1725_v41 = vld [vmem:[%s3992_s10 + $0x8] sm:$0xff] }
 0x60d   : > { %v1584_v46 = vsel %vm1522_vm12, %v1583_v39, %v1571_v42  ;;  %v1727_v39 = vld [vmem:[%s3992_s10 + $0x18] sm:$0xff]  ;;  %v1724_v42 = vld [vmem:[%s3992_s10] sm:$0xff] }
 0x60e   : > { %v1588_v47 = vperm.slane %v1584_v46, %v3619_v62  ;;  %v1602_v48 = vrot.slane %v1582_v43, 4  ;;  %v1615_v49 = vsel %vm1522_vm12, %v1599_v44, %v1614_v45  ;;  %v1612_v50 = vrot.slane %v1599_v44, 4  ;;  %1768 = vmatpush.msra.mxu3 %v1727_v39 }
 0x60f   : > { %v1623_v51 = vperm.slane %v1615_v49, %v3625_v10 }
 0x610   : > { %v1603_v52 = vsel %vm1522_vm12, %v1588_v47, %v1602_v48  ;;  %v1600_v53 = vrot.slane %v1588_v47, 4  ;;  %v1613_v54 = vsel %vm1522_vm12, %v1612_v50, %v1593_v38  ;;  %1769 = vmatpush.msra.mxu3 %v1726_v40 }
 0x611   : > { %v1611_v55 = vperm.slane %v1603_v52, %v3625_v10  ;;  %v1628_v56 = vrot.slane %v1623_v51, 4  ;;  %v1619_v57 = vperm.slane %v1613_v54, %v3625_v10 }
 0x612   : > { %v1601_v58 = vsel %vm1522_vm12, %v1600_v53, %v1582_v43  ;;  %1770 = vmatpush.msra.mxu3 %v1725_v41 }
 0x613   : > { %v1629_v59 = vsel %vm1522_vm12, %v1628_v56, %v1611_v55  ;;  %v1630_v60 = vrot.slane %v1611_v55, 4  ;;  %v1607_v61 = vperm.slane %v1601_v58, %v3625_v10  ;;  %v1624_v63 = vrot.slane %v1619_v57, 4 }
 0x614   : > { %1637 = vrot.lane.b32.xlu1 %v1629_v59, %s4013_s13  ;;  %s4041_s13 = sld [smem:[#allocation15_spill]]  ;;  %1771 = vmatpush.msra.mxu3 %v1724_v42 }
 0x615   : > { %v1631_v1 = vsel %vm1522_vm12, %v1623_v51, %v1630_v60  ;;  %v1626_v2 = vrot.slane %v1607_v61, 4  ;;  %v1625_v3 = vsel %vm1522_vm12, %v1624_v63, %v1607_v61  ;;  %v3140_v60 = vld [vmem:[%s3990_s8] ss:$0 sm:$0xff] }
 0x616   : > { %1641 = vrot.lane.b32.xlu0 %v1631_v1, %s4011_s15 }
 0x617   : > { %v1627_v4 = vsel %vm1522_vm12, %v1619_v57, %v1626_v2 }
 0x618   : > { %1633 = vrot.lane.b32.xlu2 %v1627_v4, %s4012_s29  ;;  %s4049_s29 = sld [smem:[#allocation18_spill]] }
 0x61a   : > { %s638_s27 = scalar_lea.vmem %s4041_s13, %s3036_s1  ;;  %s4044_s1 = sshll.u32 %s3577_s17, 3 }
 0x61b   : > { %v3698_v21 = vld [vmem:[%s638_s27] sm:$0xff]  ;;  %v3702_v22 = vld [vmem:[%s638_s27 + $0x8] sm:$0x3]  ;;  %s646_s15 = scalar_lea.vmem %s3985_s3, %s4044_s1  ;;  %s4046_s17 = smov 24  }
 0x61c   : > { %3013 = vmatmul.msk.f32.vlgmr.msrb.gmra.mxu0 %vm654_vm0, %v3698_v21  ;;  %s4054_s13 = sshll.u32 %s3487_s26, 3 }
 0x61d   : > { %s633_s1 = scalar_lea.vmem [#allocation5], %s4054_s13 }
 0x61e   : > { %s2845_s2 = sshll.u32 %s633_s1, 4  ;;  %s2846_s2 = int_to_ptr.vmem [resolvable:$true] %s2845_s2 }
 0x624   : > { %3014 = vmatmul.msk.f32.gmra.mxu0 %vm654_vm0, %v3702_v22 }
 0x672   : > { %v1634_v11 = vpop.permute.xlu2 %1633 }
 0x673   : > { %v1644_v12 = vsel %vm968_vm9, %v1625_v3, %v1634_v11  ;;  %v3143_v11 = vld [vmem:[%s3993_s11] ss:$0 sm:$0xff] }
 0x686   : > { %v1638_v13 = vpop.permute.xlu1 %1637 }
 0x687   : > { %v1646_v14 = vsel %vm1645_vm13, %v1644_v12, %v1638_v13 }
 0x688   : > { %v1642_v15 = vpop.permute.xlu0 %1641 }
 0x689   : > { %v1648_v16 = vsel %vm1647_vm14, %v1646_v14, %v1642_v15 }
 0x68a   : > { %2996 = vmatmul.msk.f32.vlgmr.msrb.gmra.mxu2 %vm654_vm0, %v1648_v16 }
 0x699   : > { %v1802_v28 = vpop.f32.mrf.mxu0 }
 0x69a   : > { %v3717_v30 = vadd.f32 %v3141_v29, %v1802_v28 }
 0x6a1   : > { %v1805_v31 = vpop.f32.mrf.mxu0 }
 0x6a2   : > { %v3719_v33 = vadd.f32 %v3141_v29, %v1805_v31 }
 0x6a4   : > { %v3101_v34 = vpack.i.bf16 %v3719_v33, %v3717_v30 }
 0x6a6   : > { %3102 = vrot.lane.b32.xlu0 %v3101_v34, %s3299_s21 }
 0x6ae   : > { %3107 = vrot.lane.b32.xlu0 %v3101_v34, %s4042_s12 }
 0x6b6   : > { %3112 = vrot.lane.b32.xlu0 %v3101_v34, %s4043_s22  ;;  %v3003_v34 = vld [vmem:[%s3992_s10 + $0x50] sm:$0xff] }
 0x70d   : > { %v1672_v24 = vpop.f32.mrf.mxu2 }
 0x70e   : > { %v1673_v25 = vadd.f32 %v3139_v23, %v1672_v24 }
 0x710   : > { %v3710_v26 = vadd.f32 %v1673_v25, %v3497_v0 }
 0x712   : > { %v1678_v27 = vsel %vm654_vm0, %v3710_v26, 0.0 }
 0x713   : > { %1679 = vadd.xlane.f32.xlu1 %v1678_v27 }
 0x718   : > { %v3103_v14 = vpop.permute.xlu0 %3102 }
 0x719   : > { %v3104_v15 = vunpack.i.l.bf16 %v3103_v14  ;;  %v3105_v18 = vunpack.i.h.bf16 %v3103_v14 }
 0x71b   : > { %v3116_v16 = vpack.i.bf16 %v3104_v15, %v3717_v30  ;;  %v3118_v19 = vpack.i.bf16 %v3105_v18, %v3719_v33  ;;  %v3004_v30 = vld [vmem:[%s3992_s10 + $0x58] sm:$0xff]  ;;  %v3002_v33 = vld [vmem:[%s3992_s10 + $0x48] sm:$0xff] }
 0x71c   : > { %1823 = vmatpush.msrb.mxu1 %v3004_v30 }
 0x71e   : > { %1824 = vmatpush.msrb.mxu1 %v3003_v34 }
 0x720   : > { %v3108_v17 = vpop.permute.xlu0 %3107  ;;  %1825 = vmatpush.msrb.mxu1 %v3002_v33 }
 0x721   : > { %v3109_v23 = vunpack.i.l.bf16 %v3108_v17  ;;  %v3110_v27 = vunpack.i.h.bf16 %v3108_v17 }
 0x728   : > { %v3113_v20 = vpop.permute.xlu0 %3112 }
 0x729   : > { %v3114_v24 = vunpack.i.l.bf16 %v3113_v20  ;;  %v3115_v28 = vunpack.i.h.bf16 %v3113_v20 }
 0x72b   : > { %v3125_v25 = vpack.i.bf16 %v3114_v24, %v3109_v23  ;;  %v3127_v29 = vpack.i.bf16 %v3115_v28, %v3110_v27 }
 0x786   : > { %v1680_v0 = vpop.xlane.xlu1 %1679 }
 0x787   : > { %v1681_v35 = vmul.f32 %v1680_v0, %v3501_v8  ;;  %v3001_v0 = vld [vmem:[%s3992_s10 + $0x40] sm:$0xff] }
 0x788   : > { %1826 = vmatpush.msrb.mxu1 %v3001_v0 }
 0x789   : > { %v1682_v36 = vsub.f32 %v3710_v26, %v1681_v35  ;;  %3015 = vmatmul.msk.f32.vlgmr.msrb.gmra.mxu1 %vm654_vm0, %v3698_v21  ;;  %v3144_v21 = vld [vmem:[%s3993_s11 + $0x2] ss:$0 sm:$0xff] }
 0x78b   : > { %v1683_v37 = vmul.f32 %v1682_v36, %v1682_v36  ;;  %v1718_v3 = vmul.f32 %v3140_v60, %v1682_v36 }
 0x78d   : > { %v1684_v38 = vsel %vm654_vm0, %v1683_v37, 0.0 }
 0x78e   : > { %1685 = vadd.xlane.f32.xlu2 %v1684_v38 }
 0x791   : > { %3016 = vmatmul.msk.f32.gmra.mxu1 %vm654_vm0, %v3702_v22 }
 0x801   : > { %v1686_v43 = vpop.xlane.xlu2 %1685 }
 0x802   : > { %v1687_v44 = vmul.f32 %v1686_v43, %v3546_v32 }
 0x804   : > { %3174 = vrsqrt.f32 %v1687_v44  ;;  %vm1695_vm15 = vcmp.eq.f32.partialorder %v1687_v44, inf  ;;  %v1698_v52 = vand.u32 2147483648, %v1687_v44  ;;  %vm1697_vm1 = vcmp.eq.f32.partialorder %v1687_v44, 0.0 }
 0x806   : > { %v1828_v43 = vpop.f32.mrf.mxu1 }
 0x80a   : > { %v3175_v45 = vpop.eup %3174 }
 0x80b   : > { %v1689_v46 = vmul.f32 %v3175_v45, %v1687_v44 }
 0x80d   : > { %v1690_v47 = vmul.f32 %v3175_v45, %v1689_v46  ;;  %v3780_v46 = vadd.f32 %v3144_v21, %v1828_v43 }
 0x80f   : > { %v1691_v48 = vmul.f32 0.5, %v1690_v47 }
 0x811   : > { %v1692_v49 = vsub.f32 1.5, %v1691_v48 }
 0x813   : > { %v1693_v50 = vmul.f32 %v3175_v45, %v1692_v49 }
 0x815   : > { %v1694_v51 = vmul.f32 %v1693_v50, %v1687_v44  ;;  %v651_v50 = vld [vmem:[%s646_s15] sm:$0xff] }
 0x817   : > { %v1696_v53 = vsel %vm1695_vm15, %v1687_v44, %v1694_v51 }
 0x818   : > { %v1699_v54 = vsel %vm1697_vm1, %v1698_v52, %v1696_v53 }
 0x819   : > { %v1700_v55 = vadd.f32 1e-06, %v1699_v54 }
 0x81b   : > { %3176 = vrcp.f32 %v1700_v55  ;;  %v1712_v59 = vand.u32 2147483648, %v1700_v55  ;;  %v1710_v63 = vand.u32 2147483647, %v1700_v55  ;;  %vm1706_vm3 = vweird.f32 %v1700_v55 }
 0x81d   : > { %v1713_v2 = vor.u32 1.1754944e-38, %v1712_v59  ;;  %vm1711_vm5 = vcmp.eq.f32.partialorder %v1710_v63, 8.507059e+37 }
 0x821   : > { %v3177_v56 = vpop.eup %3176 }
 0x822   : > { %v1702_v57 = vmul.f32 %v3177_v56, %v1700_v55  ;;  %vm1707_vm2 = vweird.f32 %v3177_v56 }
 0x823   : > { %vm1708_vm4 = vmor %vm1706_vm3, %vm1707_vm2 }
 0x824   : > { %v1703_v58 = vsub.f32 1.0, %v1702_v57 }
 0x826   : > { %v1704_v61 = vmul.f32 %v3177_v56, %v1703_v58 }
 0x828   : > { %v1705_v1 = vadd.f32 %v3177_v56, %v1704_v61  ;;  %v1831_v61 = vpop.f32.mrf.mxu1 }
 0x829   : > { %v1832_v63 = vadd.f32 %v3144_v21, %v1831_v61 }
 0x82a   : > { %v1709_v4 = vsel %vm1708_vm4, %v3177_v56, %v1705_v1 }
 0x82b   : > { %v1714_v6 = vsel %vm1711_vm5, %v1713_v2, %v1709_v4 }
 0x82c   : > { %v1719_v7 = vmul.f32 %v1718_v3, %v1714_v6 }
 0x82e   : > { %v1723_v9 = vadd.f32 %v3142_v5, %v1719_v7 }
 0x830   : > { %3012 = vmatmul.msk.f32.vlgmr.msra.gmra.mxu3 %vm654_vm0, %v1723_v9 }
 0x8b3   : > { %v1773_v12 = vpop.f32.mrf.mxu3 }
 0x8b4   : > { %v1774_v13 = vadd.f32 %v3143_v11, %v1773_v12 }
 0x8b6   : > { %1839 = vrot.lane.b32.xlu2 %v1774_v13, %s4043_s22  ;;  %1837 = vrot.lane.b32.xlu0 %v1774_v13, %s4042_s12 }
 0x8b7   : > { %1835 = vrot.lane.b32.xlu1 %v1774_v13, %s3299_s21 }
 0x8d8   : > { %3117 = vxpose.xlu0.b32.start [1/2] (short) (narrow) %v3116_v16, 8 }
 0x8e0   : > { %3119 = vxpose.xlu0.b32.end [2/2] (short) (narrow) %v3118_v19, 8 }
 0x8ec   : > { %3126 = vxpose.xlu1.b32.start [1/2] (short) (narrow) %v3125_v25, 8 }
 0x8f4   : > { %3128 = vxpose.xlu1.b32.end [2/2] (short) (narrow) %v3127_v29, 8 }
 0x910   : > { %v1840_v42 = vpop.permute.xlu2 %1839 }
 0x928   : > { %v1838_v31 = vpop.permute.xlu0 %1837 }
 0x929   : > { %v1836_v38 = vpop.permute.xlu1 %1835 }
 0x94e   : > { %1863 = vrot.lane.b32.xlu1 %v3780_v46, %s3299_s21 }
 0x97c   : > { %v3120_v35 = vpop.trf.xlu0 }
 0x97d   : > { %v3124_v36 = vunpack.i.h.bf16 %v3120_v35  ;;  %v3121_v37 = vunpack.i.l.bf16 %v3120_v35 }
 0x97f   : > { %2026 = vmatpush.msra.mxu2 %v3121_v37  ;;  %2048 = vmatpush.msrb.mxu3 %v3124_v36 }
 0x980   : > { %3017 = vmatmul.msk.f32.vlgmr.msra.gmra.mxu2 %vm968_vm9, %v1774_v13  ;;  %3018 = vmatmul.msk.f32.vlgmr.msrb.gmra.mxu3 %vm968_vm9, %v1836_v38 }
 0x990   : > { %v3129_v39 = vpop.trf.xlu1 }
 0x991   : > { %v3133_v40 = vunpack.i.h.bf16 %v3129_v39  ;;  %v3130_v41 = vunpack.i.l.bf16 %v3129_v39 }
 0x993   : > { %2070 = vmatpush.msrb.mxu2 %v3130_v41  ;;  %2092 = vmatpush.msra.mxu3 %v3133_v40 }
 0x994   : > { %3019 = vmatmul.msk.f32.vlgmr.msrb.gmra.mxu2 %vm968_vm9, %v1838_v31  ;;  %3020 = vmatmul.msk.f32.vlgmr.msra.gmra.mxu3 %vm968_vm9, %v1840_v42 }
 0x9c0   : > { %v1864_v29 = vpop.permute.xlu1 %1863 }
 0xa03   : > { %v2028_v44 = vpop.f32.mrf.mxu2  ;;  %v2050_v45 = vpop.f32.mrf.mxu3 }
 0xa04   : > { %v2097_v53 = vmul.f32 0.35355338, %v2028_v44  ;;  %v2098_v57 = vmul.f32 0.35355338, %v2050_v45 }
 0xa06   : > { %v2101_v56 = vadd.f32 %v2097_v53, %v651_v50  ;;  %v2102_v59 = vadd.f32 %v2098_v57, %v651_v50 }
 0xa08   : > { %v2106_v58 = vsel %vm2105_vm6, %v2101_v56, -inf  ;;  %v2109_v60 = vsel %vm2105_vm6, %v2102_v59, -inf }
 0xa17   : > { %v2072_v22 = vpop.f32.mrf.mxu2  ;;  %v2094_v47 = vpop.f32.mrf.mxu3 }
 0xa18   : > { %v2099_v48 = vmul.f32 0.35355338, %v2072_v22  ;;  %v2100_v49 = vmul.f32 0.35355338, %v2094_v47 }
 0xa1a   : > { %v2104_v51 = vadd.f32 %v2100_v49, %v651_v50  ;;  %v2103_v52 = vadd.f32 %v2099_v48, %v651_v50 }
 0xa1c   : > { %v2115_v54 = vsel %vm2105_vm6, %v2104_v51, -inf  ;;  %v2112_v55 = vsel %vm2105_vm6, %v2103_v52, -inf }
 0xa1d   : > { %2116 = vmax.xlane.f32.xlu0 %v2115_v54  ;;  %2113 = vmax.xlane.f32.xlu2 %v2112_v55 }
 0xa25   : > { %2107 = vmax.xlane.f32.xlu2 %v2106_v58 }
 0xa2d   : > { %2110 = vmax.xlane.f32.xlu2 %v2109_v60 }
 0xa31   : > { %1877 = vrot.lane.b32.xlu0 %v1832_v63, %s4043_s22 }
 0xa45   : > { %1869 = vrot.lane.b32.xlu2 %v3780_v46, %s4042_s12 }
 0xa4d   : > { %1875 = vrot.lane.b32.xlu2 %v3780_v46, %s4043_s22  ;;  %s4048_s22 = sld [smem:[#allocation17_spill]] }
 0xa55   : > { %1871 = vrot.lane.b32.xlu2 %v1832_v63, %s4042_s12  ;;  %s4047_s12 = smov 8  }
 0xa90   : > { %v2114_v1 = vpop.xlane.xlu2 %2113  ;;  %v2117_v11 = vpop.xlane.xlu0 %2116 }
 0xa91   : > { %v2120_v2 = vsub.f32 %v2103_v52, %v2114_v1  ;;  %v2121_v15 = vsub.f32 %v2104_v51, %v2117_v11 }
 0xa93   : > { %v2126_v3 = vmul.f32 1.442695, %v2120_v2  ;;  %v2128_v18 = vmul.f32 1.442695, %v2121_v15 }
 0xa95   : > { %3178 = vpow2.f32 %v2126_v3 }
 0xa98   : > { %v2108_v4 = vpop.xlane.xlu2 %2107 }
 0xa99   : > { %v2118_v5 = vsub.f32 %v2101_v56, %v2108_v4 }
 0xa9b   : > { %v2122_v6 = vmul.f32 1.442695, %v2118_v5  ;;  %v3179_v7 = vpop.eup %3178 }
 0xa9c   : > { %v2136_v9 = vsel %vm2105_vm6, %v3179_v7, 0.0 }
 0xa9d   : > { %3180 = vpow2.f32 %v2122_v6  ;;  %2137 = vadd.xlane.f32.xlu1 %v2136_v9 }
 0xaa0   : > { %v2111_v12 = vpop.xlane.xlu2 %2110 }
 0xaa1   : > { %v2119_v13 = vsub.f32 %v2102_v59, %v2111_v12 }
 0xaa3   : > { %v3800_v14 = vpop.eup %3180  ;;  %v2124_v16 = vmul.f32 1.442695, %v2119_v13  ;;  %v1878_v31 = vpop.permute.xlu0 %1877 }
 0xaa4   : > { %v2130_v17 = vsel %vm2105_vm6, %v3800_v14, 0.0 }
 0xaa5   : > { %3182 = vpow2.f32 %v2124_v16  ;;  %2131 = vadd.xlane.f32.xlu2 %v2130_v17 }
 0xaa6   : > { %3184 = vpow2.f32 %v2128_v18 }
 0xaa8   : > { %v1870_v19 = vpop.permute.xlu2 %1869 }
 0xaa9   : > { %2266 = vxpose.xlu0.b32.start [1/2] (short) (narrow) %v1870_v19, 8 }
 0xaab   : > { %v3804_v20 = vpop.eup %3182 }
 0xaac   : > { %v2133_v23 = vsel %vm2105_vm6, %v3804_v20, 0.0  ;;  %v3808_v25 = vpop.eup %3184 }
 0xaad   : > { %2134 = vadd.xlane.f32.xlu2 %v2133_v23  ;;  %v2139_v27 = vsel %vm2105_vm6, %v3808_v25, 0.0 }
 0xab0   : > { %v1876_v24 = vpop.permute.xlu2 %1875 }
 0xab5   : > { %2140 = vadd.xlane.f32.xlu2 %v2139_v27 }
 0xab8   : > { %v1872_v28 = vpop.permute.xlu2 %1871 }
 0xab9   : > { %2267 = vxpose.xlu0.b32.end [2/2] (short) (narrow) %v1872_v28, 8 }
 0xac1   : > { %2234 = vxpose.xlu0.b32.start [1/2] (short) (narrow) %v1864_v29, 8 }
 0xacd   : > { %1865 = vrot.lane.b32.xlu2 %v1832_v63, %s3299_s21  ;;  %s4045_s21 = smov 16  }
 0xad7   : > { %2298 = vxpose.xlu1.b32.start [1/2] (short) (narrow) %v1876_v24, 8 }
 0xadf   : > { %2299 = vxpose.xlu1.b32.end [2/2] (short) (narrow) %v1878_v31, 8 }
 0xaf3   : > { %2202 = vxpose.xlu2.b32.start [1/2] (short) (narrow) %v3780_v46, 8 }
 0xafb   : > { %2203 = vxpose.xlu2.b32.end [2/2] (short) (narrow) %v1832_v63, 8 }
 0xb10   : > { %v2138_v30 = vpop.xlane.xlu1 %2137 }
 0xb11   : > { %3186 = vrcp.f32 %v2138_v30  ;;  %v2181_v36 = vand.u32 2147483648, %v2138_v30  ;;  %v2179_v38 = vand.u32 2147483647, %v2138_v30  ;;  %vm2175_vm8 = vweird.f32 %v2138_v30 }
 0xb13   : > { %v2182_v41 = vor.u32 1.1754944e-38, %v2181_v36  ;;  %vm2180_vm11 = vcmp.eq.f32.partialorder %v2179_v38, 8.507059e+37 }
 0xb17   : > { %v3187_v34 = vpop.eup %3186 }
 0xb18   : > { %v2132_v33 = vpop.xlane.xlu2 %2131  ;;  %v2171_v0 = vmul.f32 %v3187_v34, %v2138_v30  ;;  %vm2176_vm7 = vweird.f32 %v3187_v34 }
 0xb19   : > { %3188 = vrcp.f32 %v2132_v33  ;;  %vm2177_vm10 = vmor %vm2175_vm8, %vm2176_vm7  ;;  %v2153_v46 = vand.u32 2147483648, %v2132_v33  ;;  %v2151_v48 = vand.u32 2147483647, %v2132_v33  ;;  %vm2147_vm1 = vweird.f32 %v2132_v33 }
 0xb1a   : > { %v2172_v35 = vsub.f32 1.0, %v2171_v0 }
 0xb1b   : > { %v2154_v51 = vor.u32 1.1754944e-38, %v2153_v46  ;;  %vm2152_vm3 = vcmp.eq.f32.partialorder %v2151_v48, 8.507059e+37 }
 0xb1c   : > { %v2173_v37 = vmul.f32 %v3187_v34, %v2172_v35 }
 0xb1e   : > { %v2174_v40 = vadd.f32 %v3187_v34, %v2173_v37 }
 0xb1f   : > { %v3189_v39 = vpop.eup %3188 }
 0xb20   : > { %v2143_v42 = vmul.f32 %v3189_v39, %v2132_v33  ;;  %v2135_v21 = vpop.xlane.xlu2 %2134  ;;  %v2178_v43 = vsel %vm2177_vm10, %v3187_v34, %v2174_v40  ;;  %vm2148_vm15 = vweird.f32 %v3189_v39 }
 0xb21   : > { %3190 = vrcp.f32 %v2135_v21  ;;  %v2183_v44 = vsel %vm2180_vm11, %v2182_v41, %v2178_v43  ;;  %vm2149_vm2 = vmor %vm2147_vm1, %vm2148_vm15  ;;  %v2167_v58 = vand.u32 2147483648, %v2135_v21  ;;  %v2165_v60 = vand.u32 2147483647, %v2135_v21 }
 0xb22   : > { %v2144_v45 = vsub.f32 1.0, %v2143_v42  ;;  %v2200_v22 = vmul.f32 %v3179_v7, %v2183_v44  ;;  %vm2161_vm5 = vweird.f32 %v2135_v21 }
 0xb23   : > { %v2168_v1 = vor.u32 1.1754944e-38, %v2167_v58  ;;  %vm2166_vm8 = vcmp.eq.f32.partialorder %v2165_v60, 8.507059e+37 }
 0xb24   : > { %v2145_v47 = vmul.f32 %v3189_v39, %v2144_v45  ;;  %3025 = vmatpush.xpose.msk.msra.mxu2 %vm2105_vm6, %v2200_v22 }
 0xb26   : > { %v2146_v49 = vadd.f32 %v3189_v39, %v2145_v47 }
 0xb27   : > { %v3191_v50 = vpop.eup %3190 }
 0xb28   : > { %v2150_v52 = vsel %vm2149_vm2, %v3189_v39, %v2146_v49  ;;  %v2157_v53 = vmul.f32 %v3191_v50, %v2135_v21  ;;  %v2141_v54 = vpop.xlane.xlu2 %2140  ;;  %vm2162_vm4 = vweird.f32 %v3191_v50 }
 0xb29   : > { %v2155_v55 = vsel %vm2152_vm3, %v2154_v51, %v2150_v52  ;;  %3192 = vrcp.f32 %v2141_v54  ;;  %vm2163_vm7 = vmor %vm2161_vm5, %vm2162_vm4  ;;  %v2195_v9 = vand.u32 2147483648, %v2141_v54  ;;  %v2193_v12 = vand.u32 2147483647, %v2141_v54 }
 0xb2a   : > { %v2158_v56 = vsub.f32 1.0, %v2157_v53  ;;  %v2198_v57 = vmul.f32 %v3800_v14, %v2155_v55  ;;  %vm2189_vm11 = vweird.f32 %v2141_v54  ;;  %vm2806_vm3 = vcmask 523264  }
 0xb2b   : > { %v2196_v14 = vor.u32 1.1754944e-38, %v2195_v9  ;;  %vm2194_vm1 = vcmp.eq.f32.partialorder %v2193_v12, 8.507059e+37 }
 0xb2c   : > { %v2159_v59 = vmul.f32 %v3191_v50, %v2158_v56  ;;  %3021 = vmatpush.xpose.msk.msra.mxu0 %vm2105_vm6, %v2198_v57 }
 0xb2e   : > { %v2160_v61 = vadd.f32 %v3191_v50, %v2159_v59 }
 0xb2f   : > { %v3193_v63 = vpop.eup %3192 }
 0xb30   : > { %v2164_v2 = vsel %vm2163_vm7, %v3191_v50, %v2160_v61  ;;  %v2185_v3 = vmul.f32 %v3193_v63, %v2141_v54  ;;  %v1866_v4 = vpop.permute.xlu2 %1865  ;;  %vm2190_vm10 = vweird.f32 %v3193_v63 }
 0xb31   : > { %v2169_v5 = vsel %vm2166_vm8, %v2168_v1, %v2164_v2  ;;  %2235 = vxpose.xlu0.b32.end [2/2] (short) (narrow) %v1866_v4, 8  ;;  %vm2191_vm15 = vmor %vm2189_vm11, %vm2190_vm10 }
 0xb32   : > { %v2186_v6 = vsub.f32 1.0, %v2185_v3  ;;  %v2199_v7 = vmul.f32 %v3804_v20, %v2169_v5 }
 0xb34   : > { %v2187_v11 = vmul.f32 %v3193_v63, %v2186_v6  ;;  %3023 = vmatpush.xpose.msk.msra.mxu1 %vm2105_vm6, %v2199_v7 }
 0xb36   : > { %v2188_v13 = vadd.f32 %v3193_v63, %v2187_v11 }
 0xb38   : > { %v2192_v15 = vsel %vm2191_vm15, %v3193_v63, %v2188_v13 }
 0xb39   : > { %v2197_v16 = vsel %vm2194_vm1, %v2196_v14, %v2192_v15 }
 0xb3a   : > { %v2201_v17 = vmul.f32 %v3808_v25, %v2197_v16 }
 0xb3c   : > { %3027 = vmatpush.xpose.msk.msrb.mxu3 %vm2105_vm6, %v2201_v17 }
 0xb55   : > { %v2282_v18 = vpop.trf.xlu0 }
 0xb56   : > { %3026 = vmatmul.msk.f32.vlgmr.msra.gmra.mxu2 %vm2105_vm6, %v2282_v18 }
 0xb7b   : > { %v2314_v20 = vpop.trf.xlu1 }
 0xb7c   : > { %3028 = vmatmul.msk.f32.vlgmr.msrb.gmra.mxu3 %vm2105_vm6, %v2314_v20 }
 0xb8c   : > { %v2218_v19 = vpop.trf.xlu2 }
 0xb8d   : > { %3022 = vmatmul.msk.f32.vlgmr.msra.gmra.mxu0 %vm2105_vm6, %v2218_v19 }
 0xbcd   : > { %v2250_v23 = vpop.trf.xlu0 }
 0xbce   : > { %3024 = vmatmul.msk.f32.vlgmr.msra.gmra.mxu1 %vm2105_vm6, %v2250_v23 }
 0xbd9   : > { %v2405_v25 = vpop.f32.mrf.mxu2 }
 0xbff   : > { %v2431_v27 = vpop.f32.mrf.mxu3 }
 0xc00   : > { %2530 = vxpose.xlu2.b32.start.end [1/1] (short) (narrow) %v2431_v27, 8 }
 0xc0a   : > { %v2353_v24 = vpop.f32.mrf.mxu0 }
 0xc0b   : > { %2434 = vxpose.xlu0.b32.start.end [1/1] (short) (narrow) %v2353_v24, 8 }
 0xc4b   : > { %v2379_v28 = vpop.f32.mrf.mxu1 }
 0xc4c   : > { %2466 = vxpose.xlu0.b32.start.end [1/1] (short) (narrow) %v2379_v28, 8 }
 0xc54   : > { %2498 = vxpose.xlu0.b32.start.end [1/1] (short) (narrow) %v2405_v25, 8 }
 0xc99   : > { %v2546_v31 = vpop.trf.xlu2 }
 0xc9a   : > { %v2574_v33 = vrot.slane %v2546_v31, 4 }
 0xcaf   : > { %v2450_v29 = vpop.trf.xlu0 }
 0xcb0   : > { %v2564_v37 = vrot.slane %v2450_v29, 4 }
 0xcf0   : > { %v2482_v30 = vpop.trf.xlu0 }
 0xcf1   : > { %v2576_v34 = vrot.slane %v2482_v30, 4  ;;  %v2575_v35 = vsel %vm1522_vm12, %v2574_v33, %v2482_v30 }
 0xcf2   : > { %v2581_v38 = vperm.slane %v2575_v35, %v3619_v62  ;;  %v3008_v35 = vld [vmem:[%s3992_s10 + $0x78] sm:$0xff] }
 0xcf3   : > { %v2577_v0 = vsel %vm1522_vm12, %v2546_v31, %v2576_v34  ;;  %2705 = vmatpush.msrb.mxu0 %v3008_v35  ;;  %v3149_v35 = vld [vmem:[%s4051_s25] ss:$0 sm:$0xff] }
 0xcf4   : > { %v2585_v36 = vperm.slane %v2577_v0, %v3619_v62  ;;  %v2586_v44 = vrot.slane %v2581_v38, 4 }
 0xcf6   : > { %v2598_v42 = vrot.slane %v2585_v36, 4 }
 0xcf8   : > { %v2514_v39 = vpop.trf.xlu0 }
 0xcf9   : > { %v2562_v40 = vrot.slane %v2514_v39, 4  ;;  %v2565_v41 = vsel %vm1522_vm12, %v2514_v39, %v2564_v37  ;;  %v3005_v37 = vld [vmem:[%s3992_s10 + $0x60] sm:$0xff] }
 0xcfa   : > { %v2573_v21 = vperm.slane %v2565_v41, %v3619_v62 }
 0xcfb   : > { %v2563_v43 = vsel %vm1522_vm12, %v2562_v40, %v2450_v29 }
 0xcfc   : > { %v2569_v45 = vperm.slane %v2563_v43, %v3619_v62  ;;  %v2599_v46 = vsel %vm1522_vm12, %v2598_v42, %v2573_v21  ;;  %v2600_v22 = vrot.slane %v2573_v21, 4  ;;  %v3145_v43 = vld [vmem:[%s3993_s11 + $0x3] ss:$0 sm:$0xff] }
 0xcfd   : > { %v2605_v47 = vperm.slane %v2599_v46, %v3625_v10 }
 0xcfe   : > { %v2587_v48 = vsel %vm1522_vm12, %v2586_v44, %v2569_v45  ;;  %v2588_v49 = vrot.slane %v2569_v45, 4  ;;  %v2601_v50 = vsel %vm1522_vm12, %v2585_v36, %v2600_v22  ;;  %v3006_v36 = vld [vmem:[%s3992_s10 + $0x68] sm:$0xff] }
 0xcff   : > { %v2593_v51 = vperm.slane %v2587_v48, %v3625_v10  ;;  %v2609_v52 = vperm.slane %v2601_v50, %v3625_v10  ;;  %v2614_v55 = vrot.slane %v2605_v47, 4 }
 0xd00   : > { %v2589_v53 = vsel %vm1522_vm12, %v2581_v38, %v2588_v49 }
 0xd01   : > { %v2597_v54 = vperm.slane %v2589_v53, %v3625_v10  ;;  %v2616_v56 = vrot.slane %v2609_v52, 4  ;;  %v2610_v57 = vrot.slane %v2593_v51, 4  ;;  %v2615_v2 = vsel %vm1522_vm12, 0.0, %v2614_v55  ;;  %v2765_v52 = vld [vmem:[%s3996_s14 + $0x18] sm:$0xff]  ;;  %v2763_v53 = vld [vmem:[%s3996_s14 + $0x8] sm:$0xff] }
 0xd02   : > { %2794 = vmatpush.msrb.mxu1 %v2765_v52 }
 0xd03   : > { %v2612_v58 = vrot.slane %v2597_v54, 4  ;;  %v2617_v59 = vsel %vm1522_vm12, 0.0, %v2616_v56  ;;  %v2629_v60 = vsel %vm1522_vm12, %v2616_v56, %v2605_v47  ;;  %v2611_v9 = vsel %vm1522_vm12, 0.0, %v2610_v57 }
 0xd04   : > { %v2633_v61 = vperm.slane %v2629_v60, %v3619_v62  ;;  %v2634_v63 = vrot.slane %v2617_v59, 4  ;;  %v2774_v60 = vld [vmem:[%s3998_s16 + $0x38] sm:$0xff] }
 0xd05   : > { %v2613_v1 = vsel %vm1522_vm12, 0.0, %v2612_v58  ;;  %v2618_v3 = vsel %vm1522_vm12, %v2612_v58, %v2593_v51  ;;  %2818 = vmatpush.msrb.mxu2 %v2774_v60 }
 0xd06   : > { %v2635_v4 = vsel %vm1522_vm12, %v2634_v63, %v2615_v2  ;;  %v2622_v5 = vperm.slane %v2618_v3, %v3619_v62  ;;  %v2623_v6 = vrot.slane %v2613_v1, 4  ;;  %v2654_v7 = vrot.slane %v2633_v61, 4  ;;  %v2771_v2 = vld [vmem:[%s3998_s16 + $0x20] sm:$0xff] }
 0xd07   : > { %v2639_v11 = vperm.slane %v2635_v4, %v3619_v62 }
 0xd08   : > { %v2624_v12 = vsel %vm1522_vm12, %v2623_v6, %v2611_v9  ;;  %v2642_v13 = vrot.slane %v2622_v5, 4 }
 0xd09   : > { %v2628_v14 = vperm.slane %v2624_v12, %v3619_v62  ;;  %v2655_v15 = vsel %vm1522_vm12, %v2639_v11, %v2654_v7  ;;  %v2652_v16 = vrot.slane %v2639_v11, 4 }
 0xd0a   : > { %v2663_v17 = vperm.slane %v2655_v15, %v3625_v10  ;;  %v3146_v15 = vld [vmem:[%s4048_s22] ss:$0 sm:$0xff]  ;;  %s3248_s22 = scalar_lea.hbm %s4052_s23, 16 }
 0xd0b   : > { %v2643_v18 = vsel %vm1522_vm12, %v2628_v14, %v2642_v13  ;;  %v2640_v19 = vrot.slane %v2628_v14, 4  ;;  %v2653_v20 = vsel %vm1522_vm12, %v2652_v16, %v2633_v61  ;;  %v2773_v61 = vld [vmem:[%s3998_s16 + $0x30] sm:$0xff] }
 0xd0c   : > { %v2651_v23 = vperm.slane %v2643_v18, %v3625_v10  ;;  %v2668_v24 = vrot.slane %v2663_v17, 4  ;;  %v2659_v27 = vperm.slane %v2653_v20, %v3625_v10  ;;  %2819 = vmatpush.msrb.mxu2 %v2773_v61 }
 0xd0d   : > { %v2641_v28 = vsel %vm1522_vm12, %v2640_v19, %v2622_v5  ;;  %v2770_v5 = vld [vmem:[%s3998_s16 + $0x18] sm:$0xff] }
 0xd0e   : > { %v2669_v25 = vsel %vm1522_vm12, %v2668_v24, %v2651_v23  ;;  %v2670_v62 = vrot.slane %v2651_v23, 4  ;;  %v2647_v29 = vperm.slane %v2641_v28, %v3625_v10  ;;  %v2664_v31 = vrot.slane %v2659_v27, 4  ;;  %v3007_v10 = vld [vmem:[%s3992_s10 + $0x70] sm:$0xff]  ;;  %v3147_v24 = vld [vmem:[%s4049_s29] ss:$0 sm:$0xff] }
 0xd0f   : > { %2677 = vrot.lane.b32.xlu1 %v2669_v25, %s4045_s21  ;;  %2706 = vmatpush.msrb.mxu0 %v3007_v10  ;;  %s4050_s21 = sld [smem:[#allocation19_spill]] }
 0xd10   : > { %v2671_v30 = vsel %vm1522_vm12, %v2663_v17, %v2670_v62  ;;  %v2666_v34 = vrot.slane %v2647_v29, 4  ;;  %v2665_v33 = vsel %vm1522_vm12, %v2664_v31, %v2647_v29  ;;  %v2769_v62 = vld [vmem:[%s3998_s16 + $0x10] sm:$0xff]  ;;  %v2768_v29 = vld [vmem:[%s3998_s16 + $0x8] sm:$0xff]  ;;  %v2767_v31 = vld [vmem:[%s3998_s16] sm:$0xff] }
 0xd11   : > { %2681 = vrot.lane.b32.xlu0 %v2671_v30, %s4046_s17  ;;  %2707 = vmatpush.msrb.mxu0 %v3006_v36  ;;  %s3033_s17 = sshll.u32 %s3422_s0, 3  ;;  %s2833_s0 = scalar_lea.sflag [#allocation4], %s3487_s26 }
 0xd12   : > { %v2667_v0 = vsel %vm1522_vm12, %v2659_v27, %v2666_v34  ;;  %s2843_s27 = scalar_lea.hbm %s4052_s23, %s3033_s17 }
 0xd13   : > { %2673 = vrot.lane.b32.xlu2 %v2667_v0, %s4047_s12  ;;  %2708 = vmatpush.msrb.mxu0 %v3005_v37  ;;  %s2847_s24 = sshll.u32 %s2843_s27, 4  ;;  %s2848_s24 = int_to_ptr.hbm [resolvable:$true] %s2847_s24 }
 0xd14   : > { %s3242_s15 = sshra.s32 %s2848_s24, 4  ;;  %s3243_s15 = int_to_ptr.hbm [resolvable:$true] %s3242_s15 }
 0xd15   : > { %v3148_v30 = vld [vmem:[%s4050_s21] ss:$0 sm:$0xff]  ;;  %s3244_s21 = scalar_lea.hbm %s3243_s15, 8  ;;  %p3249_p1 = scmp.lt.s32.totalorder %s3243_s15, %s4052_s23 }
 0xd16   : > { %p3245_p9 = scmp.ne.s32.totalorder %s3243_s15, %s3244_s21  ;;  %p3250_p3 = scmp.lt.s32.totalorder %s3248_s22, %s3244_s21 }
 0xd18   : > { %p3246_p13 = pnand %p3245_p9, %p3451_p11  ;;  %p3251_p4 = por %p3250_p3, %p3249_p1 }
 0xd1a   : > { %p3247_p0 = pneg %p3246_p13 }
 0xd1c   : > { %p3252_p7 = pnand %p3251_p4, %p3247_p0 }
 0xd6d   : > { %v2674_v38 = vpop.permute.xlu2 %2673 }
 0xd6e   : > { %v2684_v39 = vsel %vm968_vm9, %v2665_v33, %v2674_v38 }
 0xd81   : > { %v2678_v40 = vpop.permute.xlu1 %2677 }
 0xd82   : > { %v2685_v41 = vsel %vm1645_vm13, %v2684_v39, %v2678_v40 }
 0xd83   : > { %v2682_v42 = vpop.permute.xlu0 %2681 }
 0xd84   : > { %v2686_v21 = vsel %vm1647_vm14, %v2685_v41, %v2682_v42 }
 0xd85   : > { %3029 = vmatmul.msk.f32.vlgmr.msrb.gmra.mxu0 %vm654_vm0, %v2686_v21 }
 0xe02   : > { %v2710_v44 = vpop.f32.mrf.mxu0 }
 0xe03   : > { %v2711_v45 = vadd.f32 %v3145_v43, %v2710_v44 }
 0xe05   : > { %v3888_v46 = vadd.f32 %v2711_v45, %v3710_v26  ;;  %v2764_v26 = vld [vmem:[%s3996_s14 + $0x10] sm:$0xff] }
 0xe06   : > { %2795 = vmatpush.msrb.mxu1 %v2764_v26 }
 0xe07   : > { %v2716_v22 = vsel %vm654_vm0, %v3888_v46, 0.0 }
 0xe08   : > { %2717 = vadd.xlane.f32.xlu1 %v2716_v22  ;;  %2796 = vmatpush.msrb.mxu1 %v2763_v53 }
 0xe7b   : > { %v2718_v47 = vpop.xlane.xlu1 %2717 }
 0xe7c   : > { %v2719_v48 = vmul.f32 %v2718_v47, %v3501_v8  ;;  %v2762_v8 = vld [vmem:[%s3996_s14] sm:$0xff] }
 0xe7d   : > { %2797 = vmatpush.msrb.mxu1 %v2762_v8 }
 0xe7e   : > { %v2720_v49 = vsub.f32 %v3888_v46, %v2719_v48 }
 0xe80   : > { %v2721_v50 = vmul.f32 %v2720_v49, %v2720_v49  ;;  %v2756_v20 = vmul.f32 %v3146_v15, %v2720_v49 }
 0xe82   : > { %v2722_v51 = vsel %vm654_vm0, %v2721_v50, 0.0 }
 0xe83   : > { %2723 = vadd.xlane.f32.xlu2 %v2722_v51 }
 0xef6   : > { %v2724_v54 = vpop.xlane.xlu2 %2723 }
 0xef7   : > { %v2725_v55 = vmul.f32 %v2724_v54, %v3546_v32  ;;  %v2772_v32 = vld [vmem:[%s3998_s16 + $0x28] sm:$0xff] }
 0xef8   : > { %2820 = vmatpush.msrb.mxu2 %v2772_v32 }
 0xef9   : > { %3194 = vrsqrt.f32 %v2725_v55  ;;  %vm2733_vm9 = vcmp.eq.f32.partialorder %v2725_v55, inf  ;;  %v2736_v4 = vand.u32 2147483648, %v2725_v55  ;;  %vm2735_vm12 = vcmp.eq.f32.partialorder %v2725_v55, 0.0 }
 0xefa   : > { %2821 = vmatpush.msrb.mxu2 %v2771_v2 }
 0xefc   : > { %2822 = vmatpush.msrb.mxu2 %v2770_v5 }
 0xefe   : > { %2823 = vmatpush.msrb.mxu2 %v2769_v62 }
 0xeff   : > { %v3195_v56 = vpop.eup %3194 }
 0xf00   : > { %v2727_v57 = vmul.f32 %v3195_v56, %v2725_v55  ;;  %2824 = vmatpush.msrb.mxu2 %v2768_v29 }
 0xf02   : > { %v2728_v58 = vmul.f32 %v3195_v56, %v2727_v57  ;;  %2825 = vmatpush.msrb.mxu2 %v2767_v31 }
 0xf04   : > { %v2729_v59 = vmul.f32 0.5, %v2728_v58 }
 0xf06   : > { %v2730_v63 = vsub.f32 1.5, %v2729_v59 }
 0xf08   : > { %v2731_v1 = vmul.f32 %v3195_v56, %v2730_v63 }
 0xf0a   : > { %v2732_v3 = vmul.f32 %v2731_v1, %v2725_v55 }
 0xf0c   : > { %v2734_v6 = vsel %vm2733_vm9, %v2725_v55, %v2732_v3 }
 0xf0d   : > { %v2737_v7 = vsel %vm2735_vm12, %v2736_v4, %v2734_v6 }
 0xf0e   : > { %v2738_v9 = vadd.f32 1e-06, %v2737_v7 }
 0xf10   : > { %3196 = vrcp.f32 %v2738_v9  ;;  %v2750_v14 = vand.u32 2147483648, %v2738_v9  ;;  %v2748_v17 = vand.u32 2147483647, %v2738_v9  ;;  %vm2744_vm14 = vweird.f32 %v2738_v9 }
 0xf12   : > { %v2751_v19 = vor.u32 1.1754944e-38, %v2750_v14  ;;  %vm2749_vm2 = vcmp.eq.f32.partialorder %v2748_v17, 8.507059e+37 }
 0xf16   : > { %v3197_v11 = vpop.eup %3196 }
 0xf17   : > { %v2740_v12 = vmul.f32 %v3197_v11, %v2738_v9  ;;  %vm2745_vm13 = vweird.f32 %v3197_v11 }
 0xf18   : > { %vm2746_vm6 = vmor %vm2744_vm14, %vm2745_vm13 }
 0xf19   : > { %v2741_v13 = vsub.f32 1.0, %v2740_v12 }
 0xf1b   : > { %v2742_v16 = vmul.f32 %v3197_v11, %v2741_v13 }
 0xf1d   : > { %v2743_v18 = vadd.f32 %v3197_v11, %v2742_v16 }
 0xf1f   : > { %v2747_v23 = vsel %vm2746_vm6, %v3197_v11, %v2743_v18 }
 0xf20   : > { %v2752_v27 = vsel %vm2749_vm2, %v2751_v19, %v2747_v23 }
 0xf21   : > { %v2757_v28 = vmul.f32 %v2756_v20, %v2752_v27 }
 0xf23   : > { %v2761_v25 = vadd.f32 %v3147_v24, %v2757_v28 }
 0xf25   : > { %3030 = vmatmul.msk.f32.vlgmr.msrb.gmra.mxu1 %vm654_vm0, %v2761_v25 }
 0xfa2   : > { %v2799_v34 = vpop.f32.mrf.mxu1 }
 0xfa3   : > { %v2800_v33 = vadd.f32 %v3148_v30, %v2799_v34 }
 0xfa5   : > { %v2802_v0 = vmax.f32 %v2800_v33, 0.0 }
 0xfa7   : > { %3031 = vmatmul.msk.f32.vlgmr.msrb.gmra.mxu2 %vm2806_vm3, %v2802_v0 }
0x102a   : > { %v2827_v10 = vpop.f32.mrf.mxu2 }
0x102b   : > { %v2828_v36 = vadd.f32 %v3149_v35, %v2827_v10 }
0x102d   : > { %v2830_v37 = vadd.f32 %v2828_v36, %v3888_v46 }
0x102f   : > { %2831 = vst.msk [vmem:[%s633_s1] sm:$0xff] %vm654_vm0, %v2830_v37 }
0x1030   : > { %3255 = shalt.err (!%p3252_p7)
}
0x1031   : > { %3039 = dma.vmem_to_hbm [thread:$0]  (%p3451_p11), %s2846_s2, 128, %s2848_s24, %s2833_s0  }
0x1032 PF: > { %s4055_s26 = sld [smem:[#allocation8_spill]]  ;;  %p4057_p5 = scmp.ge.s32.totalorder %s3294_s30, 2 }
0x1034   : > { %p3046_p8 = pnand %p4057_p5, %p3455_p12 }
0x1036   : > { %p3047_p10 = pneg %p3046_p8 }
0x1038   : > { %s2859_s27 = sand.u32 1, %s4055_s26  }
0x1039   : > { %s2860_s13 = scalar_lea.sflag [#allocation4], %s2859_s27 }
0x103a   : > { %3277 = dma.done.wait (%p3047_p10), %s2860_s13, 128  }
0x103b   : > { %3279 = vsyncadd (%p3047_p10), %s2860_s13, 4294967168  ;;  %s4058_s30 = sld [smem:[#allocation10_spill]]  ;;  %s4061_s27 = smov %s3286_s28 }
0x103c   : > { %s4059_s1 = sld [smem:[#allocation9_spill]] }
0x103d   : > { %s4060_s29 = sld [smem:[#allocation11_spill]] }
0x1041   : > { %p31_p2 = scmp.ge.s32.totalorder %s4058_s30, 4  }
0x1042   : > { %s4062_s28 = smov %s4059_s1 }
0x1043   :  { %33 = sbr.rel (!%p31_p2) target bundleno = 14 (0xe), region = 158 }
0x1048   :  { %2866 = vsyncpa [#allocation3], 1 }
0x1049   :  { %2868 = vsyncpa [#allocation3 + $0x1], 1 }
0x104a   :  { %2869 = vsyncpa [#allocation4], 1 }
0x104b   :  { %2871 = vsyncpa [#allocation4 + $0x1], 1 }

</bundles_post_ra>
